<compile_context>
chip_gen: v7x
topology: tpu7x:2x2x1
jax: 0.10.0
libtpu: 0.0.40
codegen_flags: <defaults>
</compile_context>

<pallas_src>
import functools

import jax
import jax.numpy as jnp
from jax import lax
from jax.experimental import pallas as pl
from jax.experimental.pallas import tpu as pltpu


def _next_pow2(n):
    return 1 if n <= 1 else 1 << (int(n) - 1).bit_length()


def _round_up(x, m):
    return ((int(x) + m - 1) // m) * m


def _vmem_capacity_bytes():
    """Per-core VMEM capacity (v5e/v6e: 128 MiB, v7x: 64 MiB); safe fallback."""
    try:
        info = pltpu.get_tpu_info()
        for name in ("vmem_capacity_bytes", "vmem_bytes", "vmem_capacity"):
            cap = getattr(info, name, None)
            if cap:
                return int(cap)
    except Exception:
        pass
    return 64 * 1024 * 1024  # conservative (v7x per-core) if the query fails


def neural_hmm_kernel(emb_ref, w_ref, prior_ref, cstat_ref, out_ref, p_scratch,
                      *, n_hidden, seq_len, trans_weight, approx_recip,
                      phase2_unroll):
    """One grid step = (batch block b, time chunk tc).

    emb_ref   : (1, n_groups, Dk, g_ts*b_block)  embeddings with a ones column
                (bias) and zero pad; lane index = t_in_group*b_block + b_local.
    w_ref     : (H*H, Dk)   [weight | bias | 0], already divided by temperature
    prior_ref : (H, 1)      raw state_priors (NOT log_softmaxed; matches torch)
    cstat_ref : (H, H, 1)   (1 - trans_weight) * softmax(utrans / temperature)
    out_ref   : (T, H, b_block)        log hidden states [t, state, batch]
    p_scratch : (T_pad, H, H, b_block) mixed transition probs [t, src, dst, b]
    """
    H = n_hidden
    _, n_groups, _, GL = emb_ref.shape
    b_block = out_ref.shape[2]
    g_ts = GL // b_block
    t_chunk = n_groups * g_ts

    tc = pl.program_id(1)
    n_tc = pl.num_programs(1)

    # Loop invariants hoisted once (JAX does not CSE broadcast_in_dim).  The
    # linear bias is folded into the matmul via a ones column, so there is no
    # per-iteration bias broadcast at all.
    w_mat = w_ref[...]                                            # (H*H, Dk)
    cstat = jnp.broadcast_to(cstat_ref[...], (H, H, b_block))     # (H, H, Bb)
    tw = jnp.float32(trans_weight)

    # ------------------------------------------------------------------
    # Phase 1: bulk neural-transition probabilities for this time chunk.
    # One MXU matmul per group of g_ts timesteps (N = g_ts*b_block lanes),
    # filling the MXU N dimension and amortizing matmul issue/drain.
    # ------------------------------------------------------------------
    def build_group(g, carry):
        x = emb_ref[0, g]                                          # (Dk, GL)
        logits = jnp.dot(w_mat, x, preferred_element_type=jnp.float32)  # (H*H, GL)
        l3 = logits.reshape(H, H, GL)                              # [src, dst, t*b]
        m = jnp.max(l3, axis=1, keepdims=True)                     # (H, 1, GL)
        e = jnp.exp(l3 - m)
        s = jnp.sum(e, axis=1, keepdims=True)
        nn = e * (tw * pl.reciprocal(s, approx=approx_recip))      # w * softmax
        t0 = tc * t_chunk + g * g_ts
        # Mix with the static transition and store per timestep.  The lane
        # slices are static (vreg-aligned when b_block == 128).  p_scratch[0]
        # is never read by phase 2, but it ships with the first group's matmul
        # anyway, so skipping it is not worth a branch.
        for i in range(g_ts):
            p_t = cstat + nn[:, :, i * b_block:(i + 1) * b_block]
            p_scratch[t0 + i] = p_t.astype(p_scratch.dtype)
        return carry

    if n_groups == 1:
        build_group(0, 0)
    else:
        lax.fori_loop(0, n_groups, build_group, 0)

    # ------------------------------------------------------------------
    # Phase 2: serial alpha recursion once the whole transition table for this
    # batch block has been built (last time-chunk grid step).  The carry is
    # kept in the scaled linear domain (alpha = m + log(w), max(w) ~ 1), so no
    # exp() sits on the serial chain; only the log() feeding the output and a
    # cheap reciprocal/log on a (1, Bb) row remain.
    # ------------------------------------------------------------------
    @pl.when(tc == n_tc - 1)
    def _():
        # t = 0 stores the *raw* state_priors parameter; the torch forward does
        # NOT log_softmax it here -- intentional, do not "fix".
        alpha0 = jnp.broadcast_to(prior_ref[...], (H, b_block))     # (H, Bb)
        out_ref[0] = alpha0

        tiny = jnp.float32(jnp.finfo(jnp.float32).tiny)
        m0 = jnp.max(alpha0, axis=0, keepdims=True)                 # (1, Bb)
        w0 = jnp.exp(alpha0 - m0)                                   # one-time exp

        def recurse(t, carry):
            m, w = carry
            p_t = p_scratch[t].astype(jnp.float32)                  # (H, H, Bb)
            acc = jnp.sum(w[:, None, :] * p_t, axis=0)              # (H_dst, Bb)
            # The torch reference never reaches log(0) here because
            # acc >= max(w) * (1 - tw) * min(softmax(static)); the clamp only
            # guards f32 underflow (documented deliberate deviation).
            acc = jnp.maximum(acc, tiny)
            out_ref[t] = m + jnp.log(acc)                           # alpha_t
            # Renormalize the carry.  alpha = m + log(w) stays exact because m
            # absorbs log(r) exactly, so the approximate reciprocal introduces
            # no bias into the recursion.
            amax = jnp.max(acc, axis=0, keepdims=True)              # (1, Bb)
            r = pl.reciprocal(amax, approx=True)
            return (m - jnp.log(r), acc * r)

        lax.fori_loop(1, seq_len, recurse, (m0, w0), unroll=phase2_unroll)


def neural_hmm_forward(emb, weight, bias, state_priors, unnormalized_trans,
                       *, n_hidden, trans_weight, temperature=1.0,
                       matmul_dtype=jnp.bfloat16, prob_dtype=None,
                       b_block=None, t_chunk=None, approx_recip=None):
    """emb: (B, T, D); weight: (H*H, D) torch layout; returns (B, T, H) float32."""
    B, T, D = emb.shape
    H = n_hidden
    inv_temp = 1.0 / float(temperature)
    if approx_recip is None:
        # exact softmax reciprocal on the f32 validation path (review concern).
        approx_recip = jnp.dtype(matmul_dtype) != jnp.dtype(jnp.float32)

    # ---- host-side precompute (once, not per grid step) --------------------
    # Bias and 1/temperature are folded into the matmul via a ones column, so
    # the kernel has no per-iteration bias broadcast at all.
    Dk = _round_up(D + 1, 8)                 # features | 1 (bias) | zero pad
    w_aug = jnp.concatenate(
        [weight.astype(jnp.float32), bias.astype(jnp.float32)[:, None],
         jnp.zeros((H * H, Dk - D - 1), jnp.float32)], axis=1)
    w_mat = (w_aug * inv_temp).astype(matmul_dtype)                 # (H*H, Dk)
    trans = jax.nn.softmax(unnormalized_trans.astype(jnp.float32) * inv_temp,
                           axis=-1)
    cstat = ((1.0 - float(trans_weight)) * trans).reshape(H, H, 1).astype(jnp.float32)
    prior = state_priors.reshape(H, 1).astype(jnp.float32)

    # ---- tiling / VMEM plan (per-generation, consistent accounting) --------
    vmem_cap = _vmem_capacity_bytes()
    vmem_limit = max(8 << 20, min(vmem_cap - (4 << 20), int(vmem_cap * 0.85)))

    if b_block is None:
        b_block = 128 if B >= 128 else _next_pow2(B)
    elif b_block >= 128:
        b_block = _round_up(b_block, 128)
    else:
        b_block = _next_pow2(b_block)
    n_b = pl.cdiv(B, b_block)
    B_pad = n_b * b_block

    lane_b = _round_up(b_block, 128)         # physical lane footprint of a tile
    H8 = _round_up(H, 8)
    mm_size = jnp.dtype(matmul_dtype).itemsize

    def scratch_bytes(t_rows, pdt):
        return t_rows * H * H8 * lane_b * jnp.dtype(pdt).itemsize

    fixed = (2 * T * H8 * lane_b * 4                                    # out block
             + 2 * _round_up(H * H, 8) * _round_up(Dk, 128) * mm_size   # weight|bias
             + 2 * H8 * 128 * 4                                         # priors
             + 2 * H * H8 * 128 * 4)                                    # (1-w)*trans
    emb_bytes_per_t = 2 * Dk * b_block * mm_size       # double-buffered emb chunk
    T_est = _round_up(T, 64)                            # covers later g_ts rounding

    if prob_dtype is None:
        prob_dtype = jnp.float32
        if fixed + scratch_bytes(T_est, prob_dtype) + 8 * emb_bytes_per_t > vmem_limit:
            # v7x (64 MiB/core): fall back to bf16 transition probabilities,
            # halving the dominant VMEM resident (log is taken in f32 later).
            prob_dtype = jnp.bfloat16
    if fixed + scratch_bytes(T_est, prob_dtype) + emb_bytes_per_t > vmem_limit:
        # TODO(synk): stage p_scratch in HBM with manual double-buffered DMA
        # when T*H*H*b_block exceeds VMEM; not needed at CoNLL03-scale shapes.
        raise ValueError("NeuralHMM transition table does not fit in VMEM; "
                         "reduce b_block or the sequence length.")

    if t_chunk is None:
        avail = vmem_limit - fixed - scratch_bytes(T_est, prob_dtype)
        t_chunk = max(1, min(T, avail // emb_bytes_per_t))
    t_chunk = int(min(int(t_chunk), T))

    # Timesteps per MXU matmul group: target ~512 result lanes, capped so the
    # (H*H, lanes) f32 group intermediates stay register/VMEM friendly.
    target_lanes = max(128, min(512, (64 * 1024) // max(1, H * H)))
    g_ts = int(max(1, min(t_chunk, target_lanes // b_block, 64)))
    t_chunk = _round_up(t_chunk, g_ts)
    n_groups = t_chunk // g_ts
    n_tc = pl.cdiv(T, t_chunk)
    T_pad = n_tc * t_chunk
    GL = g_ts * b_block

    # ---- present emb lane-flat: (n_b*n_tc, n_groups, Dk, g_ts*b_block) -----
    emb_aug = jnp.concatenate(
        [emb.astype(jnp.float32), jnp.ones((B, T, 1), jnp.float32),
         jnp.zeros((B, T, Dk - D - 1), jnp.float32)],
        axis=-1).astype(matmul_dtype)
    if B_pad != B or T_pad != T:
        emb_aug = jnp.pad(emb_aug, ((0, B_pad - B), (0, T_pad - T), (0, 0)))
    emb_p = emb_aug.reshape(n_b, b_block, n_tc, n_groups, g_ts, Dk)
    emb_p = jnp.transpose(emb_p, (0, 2, 3, 5, 4, 1))    # (nb, ntc, ng, Dk, gts, bb)
    emb_p = emb_p.reshape(n_b * n_tc, n_groups, Dk, GL)

    kernel = functools.partial(
        neural_hmm_kernel,
        n_hidden=H, seq_len=T, trans_weight=float(trans_weight),
        approx_recip=bool(approx_recip),
        phase2_unroll=int(max(1, min(8, T - 1))))

    out = pl.pallas_call(
        kernel,
        out_shape=jax.ShapeDtypeStruct((T, H, B_pad), jnp.float32),
        grid_spec=pltpu.PrefetchScalarGridSpec(
            num_scalar_prefetch=0,
            grid=(n_b, n_tc),
            in_specs=[
                pl.BlockSpec((1, n_groups, Dk, GL),
                             lambda b, tc: (b * n_tc + tc, 0, 0, 0)),   # emb groups
                pl.BlockSpec((H * H, Dk), lambda b, tc: (0, 0)),        # weight|bias
                pl.BlockSpec((H, 1), lambda b, tc: (0, 0)),             # raw priors
                pl.BlockSpec((H, H, 1), lambda b, tc: (0, 0, 0)),       # (1-w)*trans
            ],
            out_specs=pl.BlockSpec((T, H, b_block), lambda b, tc: (0, 0, b)),
            scratch_shapes=[pltpu.VMEM((T_pad, H, H, b_block), prob_dtype)],
        ),
        compiler_params=pltpu.CompilerParams(
            # Batch blocks are independent ("parallel" -> megacore); the time
            # axis carries p_scratch / the output block across steps
            # ("arbitrary").  With n_b == 1 the second TensorCore on v7x idles;
            # halving b_block would only speed up phase 1 (the serial recursion
            # does not split), so it is left to the caller via b_block=.
            dimension_semantics=("parallel", "arbitrary"),
            vmem_limit_bytes=int(vmem_limit),
        ),
    )(emb_p, w_mat, prior, cstat)

    # (T, H, B_pad) -> (B, T, H)
    return jnp.transpose(out, (2, 0, 1))[:B]


def reference_forward(emb, weight, bias, state_priors, unnormalized_trans,
                      *, n_hidden, trans_weight, temperature=1.0):
    """Pure-JAX (f32) mirror of the PyTorch forward, for validation."""
    B, T, _ = emb.shape
    H = n_hidden
    logits = (emb @ weight.T + bias) / temperature                       # (B, T, H*H)
    nn_trans = jax.nn.softmax(logits.reshape(B, T, H, H), axis=-1)
    trans = jax.nn.softmax(unnormalized_trans / temperature, axis=-1)
    log_trans = jnp.log((1.0 - trans_weight) * trans[None, None]
                        + trans_weight * nn_trans)                       # (B, T, H, H)
    alphas = [jnp.broadcast_to(state_priors[None, :], (B, H))]
    for t in range(1, T):
        prev = alphas[-1]
        scores = prev[:, :, None] + log_trans[:, t, :, :]
        alphas.append(jax.scipy.special.logsumexp(scores, axis=1))
    return jnp.stack(alphas, axis=1)                                     # (B, T, H)


if __name__ == "__main__":
    TRANS_NN_WEIGHT = 0.5             # args.trans_nn_weight

    configs = [
        # (B, T, D, H, explicit t_chunk)
        dict(B=2, T=8, D=32, H=8, t_chunk=None),    # single chunk / single group
        dict(B=3, T=9, D=32, H=8, t_chunk=4),       # multi time-chunk + B,T padding
        dict(B=16, T=64, D=32, H=8, t_chunk=None),  # multi matmul-group path
    ]

    key = jax.random.PRNGKey(0)
    for cfg in configs:
        B, T, D, H = cfg["B"], cfg["T"], cfg["D"], cfg["H"]
        key, k_emb, k_w, k_b, k_trans = jax.random.split(key, 5)

        emb = jax.random.normal(k_emb, (B, T, D), dtype=jnp.float32)

        # NeuralModule Linear(d_emb, H*H): xavier_uniform with relu gain.
        gain = jnp.sqrt(2.0)
        limit = gain * jnp.sqrt(6.0 / (D + H * H))
        weight = jax.random.uniform(k_w, (H * H, D), jnp.float32,
                                    minval=-limit, maxval=limit)
        bias_bound = 1.0 / jnp.sqrt(float(D))
        bias = jax.random.uniform(k_b, (H * H,), jnp.float32,
                                  minval=-bias_bound, maxval=bias_bound)

        # state_priors = log([1, 0.001, 0.001, ...]); unnormalized_trans ~ randn.
        priors = jnp.full((H,), 0.001, dtype=jnp.float32).at[0].set(1.0)
        state_priors = jnp.log(priors)
        unnormalized_trans = jax.random.normal(k_trans, (H, H), dtype=jnp.float32)

        ref = reference_forward(emb, weight, bias, state_priors, unnormalized_trans,
                                n_hidden=H, trans_weight=TRANS_NN_WEIGHT)
        ref = jax.block_until_ready(ref)

        if T <= 16:
            # f32 MXU path (exact softmax reciprocal -> tight-ish tolerance) and
            # the bf16 MXU perf default.
            runs = [(jnp.float32, jnp.float32, 5e-3),
                    (jnp.bfloat16, jnp.float32, 5e-2)]
        else:
            # Longer T: validates the multi matmul-group indexing path and the
            # bf16 transition-table (v7x VMEM) option; fp noise accumulates over
            # T, so the tolerance just separates "correct" from "wrong" (O(1)).
            runs = [(jnp.float32, jnp.float32, 5e-2),
                    (jnp.float32, jnp.bfloat16, 5e-2)]

        for mm_dtype, p_dtype, tol in runs:
            out = neural_hmm_forward(emb, weight, bias, state_priors,
                                     unnormalized_trans, n_hidden=H,
                                     trans_weight=TRANS_NN_WEIGHT,
                                     matmul_dtype=mm_dtype, prob_dtype=p_dtype,
                                     t_chunk=cfg["t_chunk"])
            out = jax.block_until_ready(out)
            assert out.shape == (B, T, H) and out.dtype == jnp.float32
            if not bool(jnp.allclose(out, ref, atol=tol, rtol=tol)):
                raise AssertionError(
                    f"Pallas kernel mismatch vs reference (cfg={cfg}, "
                    f"matmul_dtype={mm_dtype}, prob_dtype={p_dtype}); "
                    f"max abs err = {float(jnp.max(jnp.abs(out - ref)))}")

    print("KERNEL_OK")
</pallas_src>

<mosaic_0001>
module attributes {stable_mosaic.version = 11 : i64} {
  func.func @neural_hmm_kernel(%arg0: i32, %arg1: i32, %arg2: memref<1x1x40x16xf32, #tpu.memory_space<vmem>>, %arg3: memref<64x40xf32, #tpu.memory_space<vmem>>, %arg4: memref<8x1xf32, #tpu.memory_space<vmem>>, %arg5: memref<8x8x1xf32, #tpu.memory_space<vmem>>, %arg6: memref<8x8x2xf32, #tpu.memory_space<vmem>>, %arg7: memref<8x8x8x2xf32, #tpu.memory_space<vmem>>) attributes {dimension_semantics = [#tpu.dimension_semantics<parallel>, #tpu.dimension_semantics<arbitrary>], iteration_bounds = array<i64: 1, 1>, scalar_prefetch = 0 : i64, scratch_operands = 1 : i64, tpu.core_type = #tpu.core_type<tc>, window_params = [{transform_indices = @transform_0, window_bounds = array<i64: 1, 1, 40, 16>}, {pipeline_mode = #tpu.pipeline_mode<synchronous>, transform_indices = @transform_1, window_bounds = array<i64: 64, 40>}, {pipeline_mode = #tpu.pipeline_mode<synchronous>, transform_indices = @transform_2, window_bounds = array<i64: 8, 1>}, {pipeline_mode = #tpu.pipeline_mode<synchronous>, transform_indices = @transform_3, window_bounds = array<i64: 8, 8, 1>}, {transform_indices = @transform_4, window_bounds = array<i64: 8, 8, 2>}]} {
    %c0 = arith.constant 0 : index
    %c0_0 = arith.constant 0 : index
    %0 = vector.load %arg3[%c0, %c0_0] : memref<64x40xf32, #tpu.memory_space<vmem>>, vector<64x40xf32>
    %c0_1 = arith.constant 0 : index
    %c0_2 = arith.constant 0 : index
    %c0_3 = arith.constant 0 : index
    %1 = vector.load %arg5[%c0_1, %c0_2, %c0_3] : memref<8x8x1xf32, #tpu.memory_space<vmem>>, vector<8x8x1xf32>
    %2 = vector.shape_cast %1 : vector<8x8x1xf32> to vector<8x8x1xf32>
    %3 = vector.broadcast %2 : vector<8x8x1xf32> to vector<8x8x2xf32>
    %c0_4 = arith.constant 0 : index
    %c0_5 = arith.constant 0 : index
    %c0_6 = arith.constant 0 : index
    %c0_7 = arith.constant 0 : index
    %4 = vector.load %arg2[%c0_4, %c0_5, %c0_6, %c0_7] : memref<1x1x40x16xf32, #tpu.memory_space<vmem>>, vector<1x1x40x16xf32>
    %5 = vector.shape_cast %4 : vector<1x1x40x16xf32> to vector<40x16xf32>
    %cst = arith.constant dense<0.000000e+00> : vector<64x16xf32>
    %6 = tpu.matmul %0, %5, %cst {dimension_numbers = #tpu.dot_dimension_numbers<[1], [0], [0], [1], [0, 0, 1, 1], [], []>} : vector<64x40xf32>, vector<40x16xf32>, vector<64x16xf32> -> vector<64x16xf32>
    %7 = vector.shape_cast %6 : vector<64x16xf32> to vector<8x8x16xf32>
    %cst_8 = arith.constant dense<0xFF800000> : vector<8x16xf32>
    %8 = vector.multi_reduction <maximumf>, %7, %cst_8 [1] : vector<8x8x16xf32> to vector<8x16xf32>
    %9 = vector.shape_cast %8 : vector<8x16xf32> to vector<8x1x16xf32>
    %10 = vector.broadcast %9 : vector<8x1x16xf32> to vector<8x8x16xf32>
    %11 = arith.subf %7, %10 : vector<8x8x16xf32>
    %12 = math.exp %11 : vector<8x8x16xf32>
    %cst_9 = arith.constant dense<0.000000e+00> : vector<8x16xf32>
    %13 = vector.multi_reduction <add>, %12, %cst_9 [1] : vector<8x8x16xf32> to vector<8x16xf32>
    %14 = vector.shape_cast %13 : vector<8x16xf32> to vector<8x1x16xf32>
    %15 = tpu.reciprocal %14 : vector<8x1x16xf32> -> vector<8x1x16xf32>
    %cst_10 = arith.constant 5.000000e-01 : f32
    %16 = vector.broadcast %cst_10 : f32 to vector<8x1x16xf32>
    %17 = arith.mulf %16, %15 : vector<8x1x16xf32>
    %18 = vector.broadcast %17 : vector<8x1x16xf32> to vector<8x8x16xf32>
    %19 = arith.mulf %12, %18 : vector<8x8x16xf32>
    %c8_i32 = arith.constant 8 : i32
    %20 = arith.muli %arg1, %c8_i32 : i32
    %c0_i32 = arith.constant 0 : i32
    %21 = arith.addi %20, %c0_i32 : i32
    %22 = vector.extract_strided_slice %19 {offsets = [0, 0, 0], sizes = [8, 8, 2], strides = [1, 1, 1]} : vector<8x8x16xf32> to vector<8x8x2xf32>
    %23 = arith.addf %3, %22 : vector<8x8x2xf32>
    %c0_i32_11 = arith.constant 0 : i32
    %24 = arith.addi %21, %c0_i32_11 : i32
    %25 = arith.index_cast %24 : i32 to index
    %c0_12 = arith.constant 0 : index
    %c0_13 = arith.constant 0 : index
    %c0_14 = arith.constant 0 : index
    %26 = vector.load %arg7[%25, %c0_12, %c0_13, %c0_14] : memref<8x8x8x2xf32, #tpu.memory_space<vmem>>, vector<1x8x8x2xf32>
    %27 = vector.shape_cast %26 : vector<1x8x8x2xf32> to vector<8x8x2xf32>
    %28 = vector.shape_cast %23 : vector<8x8x2xf32> to vector<1x8x8x2xf32>
    tpu.vector_store %arg7[%25, %c0_12, %c0_13, %c0_14], %28 {strides = array<i32>} : memref<8x8x8x2xf32, #tpu.memory_space<vmem>>, vector<1x8x8x2xf32>,
    %29 = vector.extract_strided_slice %19 {offsets = [0, 0, 2], sizes = [8, 8, 2], strides = [1, 1, 1]} : vector<8x8x16xf32> to vector<8x8x2xf32>
    %30 = arith.addf %3, %29 : vector<8x8x2xf32>
    %c1_i32 = arith.constant 1 : i32
    %31 = arith.addi %21, %c1_i32 : i32
    %32 = arith.index_cast %31 : i32 to index
    %c0_15 = arith.constant 0 : index
    %c0_16 = arith.constant 0 : index
    %c0_17 = arith.constant 0 : index
    %33 = vector.load %arg7[%32, %c0_15, %c0_16, %c0_17] : memref<8x8x8x2xf32, #tpu.memory_space<vmem>>, vector<1x8x8x2xf32>
    %34 = vector.shape_cast %33 : vector<1x8x8x2xf32> to vector<8x8x2xf32>
    %35 = vector.shape_cast %30 : vector<8x8x2xf32> to vector<1x8x8x2xf32>
    tpu.vector_store %arg7[%32, %c0_15, %c0_16, %c0_17], %35 {strides = array<i32>} : memref<8x8x8x2xf32, #tpu.memory_space<vmem>>, vector<1x8x8x2xf32>,
    %36 = vector.extract_strided_slice %19 {offsets = [0, 0, 4], sizes = [8, 8, 2], strides = [1, 1, 1]} : vector<8x8x16xf32> to vector<8x8x2xf32>
    %37 = arith.addf %3, %36 : vector<8x8x2xf32>
    %c2_i32 = arith.constant 2 : i32
    %38 = arith.addi %21, %c2_i32 : i32
    %39 = arith.index_cast %38 : i32 to index
    %c0_18 = arith.constant 0 : index
    %c0_19 = arith.constant 0 : index
    %c0_20 = arith.constant 0 : index
    %40 = vector.load %arg7[%39, %c0_18, %c0_19, %c0_20] : memref<8x8x8x2xf32, #tpu.memory_space<vmem>>, vector<1x8x8x2xf32>
    %41 = vector.shape_cast %40 : vector<1x8x8x2xf32> to vector<8x8x2xf32>
    %42 = vector.shape_cast %37 : vector<8x8x2xf32> to vector<1x8x8x2xf32>
    tpu.vector_store %arg7[%39, %c0_18, %c0_19, %c0_20], %42 {strides = array<i32>} : memref<8x8x8x2xf32, #tpu.memory_space<vmem>>, vector<1x8x8x2xf32>,
    %43 = vector.extract_strided_slice %19 {offsets = [0, 0, 6], sizes = [8, 8, 2], strides = [1, 1, 1]} : vector<8x8x16xf32> to vector<8x8x2xf32>
    %44 = arith.addf %3, %43 : vector<8x8x2xf32>
    %c3_i32 = arith.constant 3 : i32
    %45 = arith.addi %21, %c3_i32 : i32
    %46 = arith.index_cast %45 : i32 to index
    %c0_21 = arith.constant 0 : index
    %c0_22 = arith.constant 0 : index
    %c0_23 = arith.constant 0 : index
    %47 = vector.load %arg7[%46, %c0_21, %c0_22, %c0_23] : memref<8x8x8x2xf32, #tpu.memory_space<vmem>>, vector<1x8x8x2xf32>
    %48 = vector.shape_cast %47 : vector<1x8x8x2xf32> to vector<8x8x2xf32>
    %49 = vector.shape_cast %44 : vector<8x8x2xf32> to vector<1x8x8x2xf32>
    tpu.vector_store %arg7[%46, %c0_21, %c0_22, %c0_23], %49 {strides = array<i32>} : memref<8x8x8x2xf32, #tpu.memory_space<vmem>>, vector<1x8x8x2xf32>,
    %50 = vector.extract_strided_slice %19 {offsets = [0, 0, 8], sizes = [8, 8, 2], strides = [1, 1, 1]} : vector<8x8x16xf32> to vector<8x8x2xf32>
    %51 = arith.addf %3, %50 : vector<8x8x2xf32>
    %c4_i32 = arith.constant 4 : i32
    %52 = arith.addi %21, %c4_i32 : i32
    %53 = arith.index_cast %52 : i32 to index
    %c0_24 = arith.constant 0 : index
    %c0_25 = arith.constant 0 : index
    %c0_26 = arith.constant 0 : index
    %54 = vector.load %arg7[%53, %c0_24, %c0_25, %c0_26] : memref<8x8x8x2xf32, #tpu.memory_space<vmem>>, vector<1x8x8x2xf32>
    %55 = vector.shape_cast %54 : vector<1x8x8x2xf32> to vector<8x8x2xf32>
    %56 = vector.shape_cast %51 : vector<8x8x2xf32> to vector<1x8x8x2xf32>
    tpu.vector_store %arg7[%53, %c0_24, %c0_25, %c0_26], %56 {strides = array<i32>} : memref<8x8x8x2xf32, #tpu.memory_space<vmem>>, vector<1x8x8x2xf32>,
    %57 = vector.extract_strided_slice %19 {offsets = [0, 0, 10], sizes = [8, 8, 2], strides = [1, 1, 1]} : vector<8x8x16xf32> to vector<8x8x2xf32>
    %58 = arith.addf %3, %57 : vector<8x8x2xf32>
    %c5_i32 = arith.constant 5 : i32
    %59 = arith.addi %21, %c5_i32 : i32
    %60 = arith.index_cast %59 : i32 to index
    %c0_27 = arith.constant 0 : index
    %c0_28 = arith.constant 0 : index
    %c0_29 = arith.constant 0 : index
    %61 = vector.load %arg7[%60, %c0_27, %c0_28, %c0_29] : memref<8x8x8x2xf32, #tpu.memory_space<vmem>>, vector<1x8x8x2xf32>
    %62 = vector.shape_cast %61 : vector<1x8x8x2xf32> to vector<8x8x2xf32>
    %63 = vector.shape_cast %58 : vector<8x8x2xf32> to vector<1x8x8x2xf32>
    tpu.vector_store %arg7[%60, %c0_27, %c0_28, %c0_29], %63 {strides = array<i32>} : memref<8x8x8x2xf32, #tpu.memory_space<vmem>>, vector<1x8x8x2xf32>,
    %64 = vector.extract_strided_slice %19 {offsets = [0, 0, 12], sizes = [8, 8, 2], strides = [1, 1, 1]} : vector<8x8x16xf32> to vector<8x8x2xf32>
    %65 = arith.addf %3, %64 : vector<8x8x2xf32>
    %c6_i32 = arith.constant 6 : i32
    %66 = arith.addi %21, %c6_i32 : i32
    %67 = arith.index_cast %66 : i32 to index
    %c0_30 = arith.constant 0 : index
    %c0_31 = arith.constant 0 : index
    %c0_32 = arith.constant 0 : index
    %68 = vector.load %arg7[%67, %c0_30, %c0_31, %c0_32] : memref<8x8x8x2xf32, #tpu.memory_space<vmem>>, vector<1x8x8x2xf32>
    %69 = vector.shape_cast %68 : vector<1x8x8x2xf32> to vector<8x8x2xf32>
    %70 = vector.shape_cast %65 : vector<8x8x2xf32> to vector<1x8x8x2xf32>
    tpu.vector_store %arg7[%67, %c0_30, %c0_31, %c0_32], %70 {strides = array<i32>} : memref<8x8x8x2xf32, #tpu.memory_space<vmem>>, vector<1x8x8x2xf32>,
    %71 = vector.extract_strided_slice %19 {offsets = [0, 0, 14], sizes = [8, 8, 2], strides = [1, 1, 1]} : vector<8x8x16xf32> to vector<8x8x2xf32>
    %72 = arith.addf %3, %71 : vector<8x8x2xf32>
    %c7_i32 = arith.constant 7 : i32
    %73 = arith.addi %21, %c7_i32 : i32
    %74 = arith.index_cast %73 : i32 to index
    %c0_33 = arith.constant 0 : index
    %c0_34 = arith.constant 0 : index
    %c0_35 = arith.constant 0 : index
    %75 = vector.load %arg7[%74, %c0_33, %c0_34, %c0_35] : memref<8x8x8x2xf32, #tpu.memory_space<vmem>>, vector<1x8x8x2xf32>
    %76 = vector.shape_cast %75 : vector<1x8x8x2xf32> to vector<8x8x2xf32>
    %77 = vector.shape_cast %72 : vector<8x8x2xf32> to vector<1x8x8x2xf32>
    tpu.vector_store %arg7[%74, %c0_33, %c0_34, %c0_35], %77 {strides = array<i32>} : memref<8x8x8x2xf32, #tpu.memory_space<vmem>>, vector<1x8x8x2xf32>,
    %c0_i32_36 = arith.constant 0 : i32
    %78 = arith.cmpi eq, %arg1, %c0_i32_36 : i32
    %79 = arith.extui %78 : i1 to i32
    %c0_i32_37 = arith.constant 0 : i32
    %80 = arith.cmpi ne, %79, %c0_i32_37 : i32
    scf.if %80 {
      %c0_38 = arith.constant 0 : index
      %c0_39 = arith.constant 0 : index
      %81 = vector.load %arg4[%c0_38, %c0_39] : memref<8x1xf32, #tpu.memory_space<vmem>>, vector<8x1xf32>
      %82 = vector.shape_cast %81 : vector<8x1xf32> to vector<8x1xf32>
      %83 = vector.broadcast %82 : vector<8x1xf32> to vector<8x2xf32>
      %c0_40 = arith.constant 0 : index
      %c0_41 = arith.constant 0 : index
      %c0_42 = arith.constant 0 : index
      %84 = vector.load %arg6[%c0_40, %c0_41, %c0_42] : memref<8x8x2xf32, #tpu.memory_space<vmem>>, vector<1x8x2xf32>
      %85 = vector.shape_cast %84 : vector<1x8x2xf32> to vector<8x2xf32>
      %86 = vector.shape_cast %83 : vector<8x2xf32> to vector<1x8x2xf32>
      tpu.vector_store %arg6[%c0_40, %c0_41, %c0_42], %86 {strides = array<i32>} : memref<8x8x2xf32, #tpu.memory_space<vmem>>, vector<1x8x2xf32>,
      %cst_43 = arith.constant dense<0xFF800000> : vector<2xf32>
      %87 = vector.multi_reduction <maximumf>, %83, %cst_43 [0] : vector<8x2xf32> to vector<2xf32>
      %88 = vector.shape_cast %87 : vector<2xf32> to vector<1x2xf32>
      %89 = vector.broadcast %88 : vector<1x2xf32> to vector<8x2xf32>
      %90 = arith.subf %83, %89 : vector<8x2xf32>
      %91 = math.exp %90 : vector<8x2xf32>
      %cst_44 = arith.constant 1.17549435E-38 : f32
      %c1_i32_45 = arith.constant 1 : i32
      %92 = arith.index_cast %c1_i32_45 : i32 to index
      %c0_46 = arith.constant 0 : index
      %c0_47 = arith.constant 0 : index
      %c0_48 = arith.constant 0 : index
      %93 = vector.load %arg7[%92, %c0_46, %c0_47, %c0_48] : memref<8x8x8x2xf32, #tpu.memory_space<vmem>>, vector<1x8x8x2xf32>
      %94 = vector.shape_cast %93 : vector<1x8x8x2xf32> to vector<8x8x2xf32>
      %95 = vector.shape_cast %91 : vector<8x2xf32> to vector<8x1x2xf32>
      %96 = vector.broadcast %95 : vector<8x1x2xf32> to vector<8x8x2xf32>
      %97 = arith.mulf %96, %94 : vector<8x8x2xf32>
      %cst_49 = arith.constant dense<0.000000e+00> : vector<8x2xf32>
      %98 = vector.multi_reduction <add>, %97, %cst_49 [0] : vector<8x8x2xf32> to vector<8x2xf32>
      %99 = vector.broadcast %cst_44 : f32 to vector<8x2xf32>
      %100 = arith.maximumf %98, %99 : vector<8x2xf32>
      %101 = math.log %100 : vector<8x2xf32>
      %102 = vector.broadcast %88 : vector<1x2xf32> to vector<8x2xf32>
      %103 = arith.addf %102, %101 : vector<8x2xf32>
      %104 = arith.index_cast %c1_i32_45 : i32 to index
      %c0_50 = arith.constant 0 : index
      %c0_51 = arith.constant 0 : index
      %105 = vector.load %arg6[%104, %c0_50, %c0_51] : memref<8x8x2xf32, #tpu.memory_space<vmem>>, vector<1x8x2xf32>
      %106 = vector.shape_cast %105 : vector<1x8x2xf32> to vector<8x2xf32>
      %107 = vector.shape_cast %103 : vector<8x2xf32> to vector<1x8x2xf32>
      tpu.vector_store %arg6[%104, %c0_50, %c0_51], %107 {strides = array<i32>} : memref<8x8x2xf32, #tpu.memory_space<vmem>>, vector<1x8x2xf32>,
      %cst_52 = arith.constant dense<0xFF800000> : vector<2xf32>
      %108 = vector.multi_reduction <maximumf>, %100, %cst_52 [0] : vector<8x2xf32> to vector<2xf32>
      %109 = vector.shape_cast %108 : vector<2xf32> to vector<1x2xf32>
      %110 = tpu.reciprocal %109 {approx = true} : vector<1x2xf32> -> vector<1x2xf32>
      %111 = math.log %110 : vector<1x2xf32>
      %112 = arith.subf %88, %111 : vector<1x2xf32>
      %113 = vector.broadcast %110 : vector<1x2xf32> to vector<8x2xf32>
      %114 = arith.mulf %100, %113 : vector<8x2xf32>
      %c2_i32_53 = arith.constant 2 : i32
      %115 = arith.index_cast %c2_i32_53 : i32 to index
      %c0_54 = arith.constant 0 : index
      %c0_55 = arith.constant 0 : index
      %c0_56 = arith.constant 0 : index
      %116 = vector.load %arg7[%115, %c0_54, %c0_55, %c0_56] : memref<8x8x8x2xf32, #tpu.memory_space<vmem>>, vector<1x8x8x2xf32>
      %117 = vector.shape_cast %116 : vector<1x8x8x2xf32> to vector<8x8x2xf32>
      %118 = vector.shape_cast %114 : vector<8x2xf32> to vector<8x1x2xf32>
      %119 = vector.broadcast %118 : vector<8x1x2xf32> to vector<8x8x2xf32>
      %120 = arith.mulf %119, %117 : vector<8x8x2xf32>
      %cst_57 = arith.constant dense<0.000000e+00> : vector<8x2xf32>
      %121 = vector.multi_reduction <add>, %120, %cst_57 [0] : vector<8x8x2xf32> to vector<8x2xf32>
      %122 = vector.broadcast %cst_44 : f32 to vector<8x2xf32>
      %123 = arith.maximumf %121, %122 : vector<8x2xf32>
      %124 = math.log %123 : vector<8x2xf32>
      %125 = vector.broadcast %112 : vector<1x2xf32> to vector<8x2xf32>
      %126 = arith.addf %125, %124 : vector<8x2xf32>
      %127 = arith.index_cast %c2_i32_53 : i32 to index
      %c0_58 = arith.constant 0 : index
      %c0_59 = arith.constant 0 : index
      %128 = vector.load %arg6[%127, %c0_58, %c0_59] : memref<8x8x2xf32, #tpu.memory_space<vmem>>, vector<1x8x2xf32>
      %129 = vector.shape_cast %128 : vector<1x8x2xf32> to vector<8x2xf32>
      %130 = vector.shape_cast %126 : vector<8x2xf32> to vector<1x8x2xf32>
      tpu.vector_store %arg6[%127, %c0_58, %c0_59], %130 {strides = array<i32>} : memref<8x8x2xf32, #tpu.memory_space<vmem>>, vector<1x8x2xf32>,
      %cst_60 = arith.constant dense<0xFF800000> : vector<2xf32>
      %131 = vector.multi_reduction <maximumf>, %123, %cst_60 [0] : vector<8x2xf32> to vector<2xf32>
      %132 = vector.shape_cast %131 : vector<2xf32> to vector<1x2xf32>
      %133 = tpu.reciprocal %132 {approx = true} : vector<1x2xf32> -> vector<1x2xf32>
      %134 = math.log %133 : vector<1x2xf32>
      %135 = arith.subf %112, %134 : vector<1x2xf32>
      %136 = vector.broadcast %133 : vector<1x2xf32> to vector<8x2xf32>
      %137 = arith.mulf %123, %136 : vector<8x2xf32>
      %c3_i32_61 = arith.constant 3 : i32
      %138 = arith.index_cast %c3_i32_61 : i32 to index
      %c0_62 = arith.constant 0 : index
      %c0_63 = arith.constant 0 : index
      %c0_64 = arith.constant 0 : index
      %139 = vector.load %arg7[%138, %c0_62, %c0_63, %c0_64] : memref<8x8x8x2xf32, #tpu.memory_space<vmem>>, vector<1x8x8x2xf32>
      %140 = vector.shape_cast %139 : vector<1x8x8x2xf32> to vector<8x8x2xf32>
      %141 = vector.shape_cast %137 : vector<8x2xf32> to vector<8x1x2xf32>
      %142 = vector.broadcast %141 : vector<8x1x2xf32> to vector<8x8x2xf32>
      %143 = arith.mulf %142, %140 : vector<8x8x2xf32>
      %cst_65 = arith.constant dense<0.000000e+00> : vector<8x2xf32>
      %144 = vector.multi_reduction <add>, %143, %cst_65 [0] : vector<8x8x2xf32> to vector<8x2xf32>
      %145 = vector.broadcast %cst_44 : f32 to vector<8x2xf32>
      %146 = arith.maximumf %144, %145 : vector<8x2xf32>
      %147 = math.log %146 : vector<8x2xf32>
      %148 = vector.broadcast %135 : vector<1x2xf32> to vector<8x2xf32>
      %149 = arith.addf %148, %147 : vector<8x2xf32>
      %150 = arith.index_cast %c3_i32_61 : i32 to index
      %c0_66 = arith.constant 0 : index
      %c0_67 = arith.constant 0 : index
      %151 = vector.load %arg6[%150, %c0_66, %c0_67] : memref<8x8x2xf32, #tpu.memory_space<vmem>>, vector<1x8x2xf32>
      %152 = vector.shape_cast %151 : vector<1x8x2xf32> to vector<8x2xf32>
      %153 = vector.shape_cast %149 : vector<8x2xf32> to vector<1x8x2xf32>
      tpu.vector_store %arg6[%150, %c0_66, %c0_67], %153 {strides = array<i32>} : memref<8x8x2xf32, #tpu.memory_space<vmem>>, vector<1x8x2xf32>,
      %cst_68 = arith.constant dense<0xFF800000> : vector<2xf32>
      %154 = vector.multi_reduction <maximumf>, %146, %cst_68 [0] : vector<8x2xf32> to vector<2xf32>
      %155 = vector.shape_cast %154 : vector<2xf32> to vector<1x2xf32>
      %156 = tpu.reciprocal %155 {approx = true} : vector<1x2xf32> -> vector<1x2xf32>
      %157 = math.log %156 : vector<1x2xf32>
      %158 = arith.subf %135, %157 : vector<1x2xf32>
      %159 = vector.broadcast %156 : vector<1x2xf32> to vector<8x2xf32>
      %160 = arith.mulf %146, %159 : vector<8x2xf32>
      %c4_i32_69 = arith.constant 4 : i32
      %161 = arith.index_cast %c4_i32_69 : i32 to index
      %c0_70 = arith.constant 0 : index
      %c0_71 = arith.constant 0 : index
      %c0_72 = arith.constant 0 : index
      %162 = vector.load %arg7[%161, %c0_70, %c0_71, %c0_72] : memref<8x8x8x2xf32, #tpu.memory_space<vmem>>, vector<1x8x8x2xf32>
      %163 = vector.shape_cast %162 : vector<1x8x8x2xf32> to vector<8x8x2xf32>
      %164 = vector.shape_cast %160 : vector<8x2xf32> to vector<8x1x2xf32>
      %165 = vector.broadcast %164 : vector<8x1x2xf32> to vector<8x8x2xf32>
      %166 = arith.mulf %165, %163 : vector<8x8x2xf32>
      %cst_73 = arith.constant dense<0.000000e+00> : vector<8x2xf32>
      %167 = vector.multi_reduction <add>, %166, %cst_73 [0] : vector<8x8x2xf32> to vector<8x2xf32>
      %168 = vector.broadcast %cst_44 : f32 to vector<8x2xf32>
      %169 = arith.maximumf %167, %168 : vector<8x2xf32>
      %170 = math.log %169 : vector<8x2xf32>
      %171 = vector.broadcast %158 : vector<1x2xf32> to vector<8x2xf32>
      %172 = arith.addf %171, %170 : vector<8x2xf32>
      %173 = arith.index_cast %c4_i32_69 : i32 to index
      %c0_74 = arith.constant 0 : index
      %c0_75 = arith.constant 0 : index
      %174 = vector.load %arg6[%173, %c0_74, %c0_75] : memref<8x8x2xf32, #tpu.memory_space<vmem>>, vector<1x8x2xf32>
      %175 = vector.shape_cast %174 : vector<1x8x2xf32> to vector<8x2xf32>
      %176 = vector.shape_cast %172 : vector<8x2xf32> to vector<1x8x2xf32>
      tpu.vector_store %arg6[%173, %c0_74, %c0_75], %176 {strides = array<i32>} : memref<8x8x2xf32, #tpu.memory_space<vmem>>, vector<1x8x2xf32>,
      %cst_76 = arith.constant dense<0xFF800000> : vector<2xf32>
      %177 = vector.multi_reduction <maximumf>, %169, %cst_76 [0] : vector<8x2xf32> to vector<2xf32>
      %178 = vector.shape_cast %177 : vector<2xf32> to vector<1x2xf32>
      %179 = tpu.reciprocal %178 {approx = true} : vector<1x2xf32> -> vector<1x2xf32>
      %180 = math.log %179 : vector<1x2xf32>
      %181 = arith.subf %158, %180 : vector<1x2xf32>
      %182 = vector.broadcast %179 : vector<1x2xf32> to vector<8x2xf32>
      %183 = arith.mulf %169, %182 : vector<8x2xf32>
      %c5_i32_77 = arith.constant 5 : i32
      %184 = arith.index_cast %c5_i32_77 : i32 to index
      %c0_78 = arith.constant 0 : index
      %c0_79 = arith.constant 0 : index
      %c0_80 = arith.constant 0 : index
      %185 = vector.load %arg7[%184, %c0_78, %c0_79, %c0_80] : memref<8x8x8x2xf32, #tpu.memory_space<vmem>>, vector<1x8x8x2xf32>
      %186 = vector.shape_cast %185 : vector<1x8x8x2xf32> to vector<8x8x2xf32>
      %187 = vector.shape_cast %183 : vector<8x2xf32> to vector<8x1x2xf32>
      %188 = vector.broadcast %187 : vector<8x1x2xf32> to vector<8x8x2xf32>
      %189 = arith.mulf %188, %186 : vector<8x8x2xf32>
      %cst_81 = arith.constant dense<0.000000e+00> : vector<8x2xf32>
      %190 = vector.multi_reduction <add>, %189, %cst_81 [0] : vector<8x8x2xf32> to vector<8x2xf32>
      %191 = vector.broadcast %cst_44 : f32 to vector<8x2xf32>
      %192 = arith.maximumf %190, %191 : vector<8x2xf32>
      %193 = math.log %192 : vector<8x2xf32>
      %194 = vector.broadcast %181 : vector<1x2xf32> to vector<8x2xf32>
      %195 = arith.addf %194, %193 : vector<8x2xf32>
      %196 = arith.index_cast %c5_i32_77 : i32 to index
      %c0_82 = arith.constant 0 : index
      %c0_83 = arith.constant 0 : index
      %197 = vector.load %arg6[%196, %c0_82, %c0_83] : memref<8x8x2xf32, #tpu.memory_space<vmem>>, vector<1x8x2xf32>
      %198 = vector.shape_cast %197 : vector<1x8x2xf32> to vector<8x2xf32>
      %199 = vector.shape_cast %195 : vector<8x2xf32> to vector<1x8x2xf32>
      tpu.vector_store %arg6[%196, %c0_82, %c0_83], %199 {strides = array<i32>} : memref<8x8x2xf32, #tpu.memory_space<vmem>>, vector<1x8x2xf32>,
      %cst_84 = arith.constant dense<0xFF800000> : vector<2xf32>
      %200 = vector.multi_reduction <maximumf>, %192, %cst_84 [0] : vector<8x2xf32> to vector<2xf32>
      %201 = vector.shape_cast %200 : vector<2xf32> to vector<1x2xf32>
      %202 = tpu.reciprocal %201 {approx = true} : vector<1x2xf32> -> vector<1x2xf32>
      %203 = math.log %202 : vector<1x2xf32>
      %204 = arith.subf %181, %203 : vector<1x2xf32>
      %205 = vector.broadcast %202 : vector<1x2xf32> to vector<8x2xf32>
      %206 = arith.mulf %192, %205 : vector<8x2xf32>
      %c6_i32_85 = arith.constant 6 : i32
      %207 = arith.index_cast %c6_i32_85 : i32 to index
      %c0_86 = arith.constant 0 : index
      %c0_87 = arith.constant 0 : index
      %c0_88 = arith.constant 0 : index
      %208 = vector.load %arg7[%207, %c0_86, %c0_87, %c0_88] : memref<8x8x8x2xf32, #tpu.memory_space<vmem>>, vector<1x8x8x2xf32>
      %209 = vector.shape_cast %208 : vector<1x8x8x2xf32> to vector<8x8x2xf32>
      %210 = vector.shape_cast %206 : vector<8x2xf32> to vector<8x1x2xf32>
      %211 = vector.broadcast %210 : vector<8x1x2xf32> to vector<8x8x2xf32>
      %212 = arith.mulf %211, %209 : vector<8x8x2xf32>
      %cst_89 = arith.constant dense<0.000000e+00> : vector<8x2xf32>
      %213 = vector.multi_reduction <add>, %212, %cst_89 [0] : vector<8x8x2xf32> to vector<8x2xf32>
      %214 = vector.broadcast %cst_44 : f32 to vector<8x2xf32>
      %215 = arith.maximumf %213, %214 : vector<8x2xf32>
      %216 = math.log %215 : vector<8x2xf32>
      %217 = vector.broadcast %204 : vector<1x2xf32> to vector<8x2xf32>
      %218 = arith.addf %217, %216 : vector<8x2xf32>
      %219 = arith.index_cast %c6_i32_85 : i32 to index
      %c0_90 = arith.constant 0 : index
      %c0_91 = arith.constant 0 : index
      %220 = vector.load %arg6[%219, %c0_90, %c0_91] : memref<8x8x2xf32, #tpu.memory_space<vmem>>, vector<1x8x2xf32>
      %221 = vector.shape_cast %220 : vector<1x8x2xf32> to vector<8x2xf32>
      %222 = vector.shape_cast %218 : vector<8x2xf32> to vector<1x8x2xf32>
      tpu.vector_store %arg6[%219, %c0_90, %c0_91], %222 {strides = array<i32>} : memref<8x8x2xf32, #tpu.memory_space<vmem>>, vector<1x8x2xf32>,
      %cst_92 = arith.constant dense<0xFF800000> : vector<2xf32>
      %223 = vector.multi_reduction <maximumf>, %215, %cst_92 [0] : vector<8x2xf32> to vector<2xf32>
      %224 = vector.shape_cast %223 : vector<2xf32> to vector<1x2xf32>
      %225 = tpu.reciprocal %224 {approx = true} : vector<1x2xf32> -> vector<1x2xf32>
      %226 = math.log %225 : vector<1x2xf32>
      %227 = arith.subf %204, %226 : vector<1x2xf32>
      %228 = vector.broadcast %225 : vector<1x2xf32> to vector<8x2xf32>
      %229 = arith.mulf %215, %228 : vector<8x2xf32>
      %c7_i32_93 = arith.constant 7 : i32
      %230 = arith.index_cast %c7_i32_93 : i32 to index
      %c0_94 = arith.constant 0 : index
      %c0_95 = arith.constant 0 : index
      %c0_96 = arith.constant 0 : index
      %231 = vector.load %arg7[%230, %c0_94, %c0_95, %c0_96] : memref<8x8x8x2xf32, #tpu.memory_space<vmem>>, vector<1x8x8x2xf32>
      %232 = vector.shape_cast %231 : vector<1x8x8x2xf32> to vector<8x8x2xf32>
      %233 = vector.shape_cast %229 : vector<8x2xf32> to vector<8x1x2xf32>
      %234 = vector.broadcast %233 : vector<8x1x2xf32> to vector<8x8x2xf32>
      %235 = arith.mulf %234, %232 : vector<8x8x2xf32>
      %cst_97 = arith.constant dense<0.000000e+00> : vector<8x2xf32>
      %236 = vector.multi_reduction <add>, %235, %cst_97 [0] : vector<8x8x2xf32> to vector<8x2xf32>
      %237 = vector.broadcast %cst_44 : f32 to vector<8x2xf32>
      %238 = arith.maximumf %236, %237 : vector<8x2xf32>
      %239 = math.log %238 : vector<8x2xf32>
      %240 = vector.broadcast %227 : vector<1x2xf32> to vector<8x2xf32>
      %241 = arith.addf %240, %239 : vector<8x2xf32>
      %242 = arith.index_cast %c7_i32_93 : i32 to index
      %c0_98 = arith.constant 0 : index
      %c0_99 = arith.constant 0 : index
      %243 = vector.load %arg6[%242, %c0_98, %c0_99] : memref<8x8x2xf32, #tpu.memory_space<vmem>>, vector<1x8x2xf32>
      %244 = vector.shape_cast %243 : vector<1x8x2xf32> to vector<8x2xf32>
      %245 = vector.shape_cast %241 : vector<8x2xf32> to vector<1x8x2xf32>
      tpu.vector_store %arg6[%242, %c0_98, %c0_99], %245 {strides = array<i32>} : memref<8x8x2xf32, #tpu.memory_space<vmem>>, vector<1x8x2xf32>,
      %cst_100 = arith.constant dense<0xFF800000> : vector<2xf32>
      %246 = vector.multi_reduction <maximumf>, %238, %cst_100 [0] : vector<8x2xf32> to vector<2xf32>
      %247 = vector.shape_cast %246 : vector<2xf32> to vector<1x2xf32>
      %248 = tpu.reciprocal %247 {approx = true} : vector<1x2xf32> -> vector<1x2xf32>
      %249 = math.log %248 : vector<1x2xf32>
      %250 = arith.subf %227, %249 : vector<1x2xf32>
      %251 = vector.broadcast %248 : vector<1x2xf32> to vector<8x2xf32>
      %252 = arith.mulf %238, %251 : vector<8x2xf32>
      %c7_i32_101 = arith.constant 7 : i32
    } else {
    }
    return
  }
  func.func @transform_0(%arg0: i32, %arg1: i32) -> (i32, i32, i32, i32) {
    %c1_i32 = arith.constant 1 : i32
    %0 = arith.muli %arg0, %c1_i32 : i32
    %1 = arith.addi %0, %arg1 : i32
    %c0_i32 = arith.constant 0 : i32
    %c0_i32_0 = arith.constant 0 : i32
    %c0_i32_1 = arith.constant 0 : i32
    %c0_i32_2 = arith.constant 0 : i32
    return %1, %c0_i32, %c0_i32_0, %c0_i32_1 : i32, i32, i32, i32
  }
  func.func @transform_1(%arg0: i32, %arg1: i32) -> (i32, i32) {
    %c0_i32 = arith.constant 0 : i32
    %c0_i32_0 = arith.constant 0 : i32
    %c0_i32_1 = arith.constant 0 : i32
    return %c0_i32, %c0_i32_0 : i32, i32
  }
  func.func @transform_2(%arg0: i32, %arg1: i32) -> (i32, i32) {
    %c0_i32 = arith.constant 0 : i32
    %c0_i32_0 = arith.constant 0 : i32
    %c0_i32_1 = arith.constant 0 : i32
    return %c0_i32, %c0_i32_0 : i32, i32
  }
  func.func @transform_3(%arg0: i32, %arg1: i32) -> (i32, i32, i32) {
    %c0_i32 = arith.constant 0 : i32
    %c0_i32_0 = arith.constant 0 : i32
    %c0_i32_1 = arith.constant 0 : i32
    %c0_i32_2 = arith.constant 0 : i32
    return %c0_i32, %c0_i32_0, %c0_i32_1 : i32, i32, i32
  }
  func.func @transform_4(%arg0: i32, %arg1: i32) -> (i32, i32, i32) {
    %c0_i32 = arith.constant 0 : i32
    %c0_i32_0 = arith.constant 0 : i32
    %c0_i32_1 = arith.constant 0 : i32
    return %c0_i32, %c0_i32_0, %arg0 : i32, i32, i32
  }
}

</mosaic_0001>

<bundles_post_ra>
// kernel: tpu_custom_call.1
= control target key start
LH: loop header
LB: loop body
LE: loop exit
PB: predicated region body
PF: predicated region fallthrough
CT: control target
= control target key end

     0   :  { %vm98_vm0 = vcmask 326656   ;;  %v1765_v3 = vmov 0   ;;  %vm400_vm1 = vcmask 15360   ;;  %vm228_vm2 = vcmask 130048   ;;  %s1767_s6 = smov 124   ;;  %s1768_s7 = smov 122   ;;  %s2306_s0 = inlined_call_operand.vmem [shape: f32[1,1,40,16], index: 0, kind: input, shape index: {}]   ;;  %s2307_s1 = inlined_call_operand.vmem [shape: f32[64,40], index: 1, kind: input, shape index: {}]   ;;  %s2308_s3 = inlined_call_operand.vmem [shape: f32[8,8,1], index: 3, kind: input, shape index: {}]   ;;  %s2309_s2 = inlined_call_operand.vmem [shape: f32[8,1], index: 2, kind: input, shape index: {}]   ;;  %s2310_s4 = inlined_call_operand.vmem [shape: f32[8,8,2], index: 4, kind: output, shape index: {}]  }
   0x1   :  { %v93_v0 = vld [vmem:[%s2306_s0] sm:$0xff]  ;;  %v94_v1 = vld [vmem:[%s2306_s0 + $0x8] sm:$0xff]  ;;  %v95_v2 = vld [vmem:[%s2306_s0 + $0x10] sm:$0xff]  ;;  %1691 = vset.pattern.permute.xlu0 %v1765_v3  ;;  %1692 = vset.pattern.permute.xlu1 %v1765_v3  ;;  %s1769_s8 = smov 120   ;;  %s1770_s9 = smov 118  }
   0x2   :  { %v1668_v4 = vpack.c.bf16 %v94_v1, %v93_v0  ;;  %v96_v5 = vld [vmem:[%s2306_s0 + $0x18] sm:$0xff]  ;;  %v37_v6 = vld [vmem:[%s2307_s1] sm:$0xff]  ;;  %v47_v11 = vld [vmem:[%s2308_s3 + $0x10] sm:$0xff]  ;;  %s1771_s10 = smov 116  }
   0x3   :  { %v1672_v7 = vpack.c.bf16 %v96_v5, %v95_v2  ;;  %1656 = vmatprep.mubr.msk.f32.mxu0 %vm98_vm0, %v37_v6  ;;  %v41_v8 = vld [vmem:[%s2307_s1 + $0x20] sm:$0xff]  ;;  %v46_v12 = vld [vmem:[%s2308_s3 + $0x8] sm:$0xff]  ;;  %65 = vperm.xlu1 %1692, %v47_v11   ;;  %v48_v13 = vld [vmem:[%s2308_s3 + $0x18] sm:$0xff] }
   0x4   :  { %1669 = vmatprep.subr.bf16.mxu0 %v1668_v4  ;;  %1676 = vmatprep.subr.bf16.mxu1 %v1668_v4  ;;  %v45_v9 = vld [vmem:[%s2308_s3] sm:$0xff]  ;;  %v38_v14 = vld [vmem:[%s2307_s1 + $0x8] sm:$0xff]  ;;  %v39_v16 = vld [vmem:[%s2307_s1 + $0x10] sm:$0xff] }
   0x5   :  { %1671 = vmatpush3.bf16.msra.mxu0 %v1668_v4  ;;  %1679 = vmatpush3.bf16.msra.mxu1 %v1668_v4  ;;  %v97_v10 = vld [vmem:[%s2306_s0 + $0x20] sm:$0xff]  ;;  %v42_v15 = vld [vmem:[%s2307_s1 + $0x28] sm:$0xff]  ;;  %v43_v17 = vld [vmem:[%s2307_s1 + $0x30] sm:$0xff]  ;;  %s1772_s0 = smov 114  }
   0x6   :  { %1673 = vmatprep.subr.bf16.mxu0 %v1672_v7  ;;  %1677 = vmatprep.subr.bf16.mxu1 %v1672_v7  ;;  %v49_v18 = vld [vmem:[%s2308_s3 + $0x20] sm:$0xff]  ;;  %v50_v19 = vld [vmem:[%s2308_s3 + $0x28] sm:$0xff]  ;;  %v40_v20 = vld [vmem:[%s2307_s1 + $0x18] sm:$0xff] }
   0x7   :  { %1662 = vmatprep.mubr.msk.f32.mxu1 %vm98_vm0, %v41_v8  ;;  %55 = vperm.xlu0 %1691, %v45_v9   ;;  %v44_v21 = vld [vmem:[%s2307_s1 + $0x38] sm:$0xff]  ;;  %v51_v22 = vld [vmem:[%s2308_s3 + $0x30] sm:$0xff]  ;;  %v666_v24 = vld [vmem:[%s2309_s2] sm:$0xff]  ;;  %s1766_s2 = smov 126  }
   0x8   :  { %70 = vperm.xlu1 %1692, %v48_v13   ;;  %v52_v23 = vld [vmem:[%s2308_s3 + $0x38] sm:$0xff] }
   0x9   :  { %1675 = vmatpush3.bf16.msra.mxu0 %v1672_v7  ;;  %1680 = vmatpush3.bf16.msra.mxu1 %v1672_v7 }
   0xa   :  { %1654 = vmatprep.subr.mxu0 %v97_v10  ;;  %1678 = vmatprep.subr.mxu1 %v97_v10 }
   0xb   :  { %60 = vperm.xlu0 %1691, %v46_v12  }
   0xc   :  { %80 = vperm.xlu1 %1692, %v50_v19  }
   0xd   :  { %1655 = vmatpush3.msra.mxu0 %v97_v10  ;;  %1681 = vmatpush3.msra.mxu1 %v97_v10 }
   0xe   :  { %1657 = vmatmul.mubr.msk.f32.vlgmr.msra.gmra.mrb[0].mxu0 %vm98_vm0, %v38_v14  ;;  %1663 = vmatmul.mubr.msk.f32.vlgmr.msra.gmra.mrb[0].mxu1 %vm98_vm0, %v42_v15 }
   0xf   :  { %1659 = vmatprep.mubr.msk.f32.mxu0 %vm98_vm0, %v39_v16  ;;  %1665 = vmatprep.mubr.msk.f32.mxu1 %vm98_vm0, %v43_v17 }
  0x10   :  { %75 = vperm.xlu0 %1691, %v49_v18   ;;  %90 = vperm.xlu1 %1692, %v52_v23  }
  0x12   :  { %1660 = vmatmul.mubr.msk.f32.gmra.mrb[2].mxu0 %vm98_vm0, %v40_v20  ;;  %1666 = vmatmul.mubr.msk.f32.gmra.mrb[2].mxu1 %vm98_vm0, %v44_v21 }
  0x14   :  { %85 = vperm.xlu0 %1691, %v51_v22  }
  0x18   :  { %669 = vperm.xlu0 %1691, %v666_v24  }
  0x86   :  { %v1873_v25 = vpop.permute.xlu0 %55 }
  0x8a   :  { %v1875_v26 = vpop.permute.xlu0 %60 }
  0x8f   :  { %v1877_v27 = vpop.permute.xlu0 %75 }
  0x93   :  { %v1879_v28 = vpop.permute.xlu0 %85 }
  0x97   :  { %v1881_v29 = vpop.permute.xlu0 %669 }
  0x98   :  { %672 = vst.msk [vmem:[%s2310_s4] sm:$0xff] %vm400_vm1, %v1881_v29 }
  0xe1   :  { %v1658_v30 = vpop.f32.mrb[0].mxu0  ;;  %v1664_v31 = vpop.f32.mrb[0].mxu1 }
  0xe2   :  { %v236_v32 = vsel %vm228_vm2, %v1658_v30, -inf  ;;  %v264_v33 = vsel %vm228_vm2, %v1664_v31, -inf  ;;  %v189_v34 = vpop.f32.mrb[1].mxu0  ;;  %v209_v35 = vpop.f32.mrb[1].mxu1 }
  0xe3   :  { %v237_v36 = vrot.slane %v236_v32, 4  ;;  %v265_v37 = vrot.slane %v264_v33, 4  ;;  %v229_v38 = vsel %vm228_vm2, %v189_v34, -inf  ;;  %v257_v39 = vsel %vm228_vm2, %v209_v35, -inf }
  0xe4   :  { %v230_v40 = vrot.slane %v229_v38, 4  ;;  %v258_v41 = vrot.slane %v257_v39, 4 }
  0xe5   :  { %v238_v42 = vmax.f32 %v236_v32, %v237_v36  ;;  %v266_v43 = vmax.f32 %v264_v33, %v265_v37  ;;  %v1892_v44 = vpop.f32.mrb[2].mxu0  ;;  %v1894_v45 = vpop.f32.mrb[2].mxu1 }
  0xe6   :  { %v231_v46 = vmax.f32 %v229_v38, %v230_v40  ;;  %v259_v47 = vmax.f32 %v257_v39, %v258_v41  ;;  %v250_v48 = vsel %vm228_vm2, %v1892_v44, -inf  ;;  %v278_v49 = vsel %vm228_vm2, %v1894_v45, -inf  ;;  %v1900_v50 = vpop.f32.mrb[3].mxu0  ;;  %v1902_v51 = vpop.f32.mrb[3].mxu1 }
  0xe7   :  { %v239_v52 = vrot.slane %v238_v42, 2  ;;  %v267_v53 = vrot.slane %v266_v43, 2  ;;  %v251_v54 = vrot.slane %v250_v48, 4  ;;  %v279_v55 = vrot.slane %v278_v49, 4 }
  0xe8   :  { %v232_v56 = vrot.slane %v231_v46, 2  ;;  %v260_v57 = vrot.slane %v259_v47, 2  ;;  %v243_v58 = vsel %vm228_vm2, %v1900_v50, -inf  ;;  %v271_v59 = vsel %vm228_vm2, %v1902_v51, -inf }
  0xe9   :  { %v240_v60 = vmax.f32 %v238_v42, %v239_v52  ;;  %v268_v61 = vmax.f32 %v266_v43, %v267_v53  ;;  %v252_v62 = vmax.f32 %v250_v48, %v251_v54  ;;  %v280_v63 = vmax.f32 %v278_v49, %v279_v55 }
  0xea   :  { %v233_v0 = vmax.f32 %v231_v46, %v232_v56  ;;  %v261_v1 = vmax.f32 %v259_v47, %v260_v57  ;;  %v244_v2 = vrot.slane %v243_v58, 4  ;;  %v272_v3 = vrot.slane %v271_v59, 4 }
  0xeb   :  { %v241_v4 = vrot.slane %v240_v60, 1  ;;  %v269_v5 = vrot.slane %v268_v61, 1  ;;  %v253_v6 = vrot.slane %v252_v62, 2  ;;  %v281_v7 = vrot.slane %v280_v63, 2 }
  0xec   :  { %v234_v8 = vrot.slane %v233_v0, 1  ;;  %v262_v9 = vrot.slane %v261_v1, 1  ;;  %v245_v10 = vmax.f32 %v243_v58, %v244_v2  ;;  %v273_v11 = vmax.f32 %v271_v59, %v272_v3 }
  0xed   :  { %v242_v12 = vmax.f32 %v240_v60, %v241_v4  ;;  %v270_v13 = vmax.f32 %v268_v61, %v269_v5  ;;  %v254_v14 = vmax.f32 %v252_v62, %v253_v6  ;;  %v282_v15 = vmax.f32 %v280_v63, %v281_v7 }
  0xee   :  { %v235_v16 = vmax.f32 %v233_v0, %v234_v8  ;;  %v263_v17 = vmax.f32 %v261_v1, %v262_v9  ;;  %v246_v18 = vrot.slane %v245_v10, 2  ;;  %v274_v19 = vrot.slane %v273_v11, 2 }
  0xef   :  { %v286_v20 = vsub.f32 %v1658_v30, %v242_v12  ;;  %v290_v21 = vsub.f32 %v1664_v31, %v270_v13  ;;  %v255_v22 = vrot.slane %v254_v14, 1  ;;  %v283_v23 = vrot.slane %v282_v15, 1 }
  0xf0   :  { %v285_v24 = vsub.f32 %v189_v34, %v235_v16  ;;  %v289_v32 = vsub.f32 %v209_v35, %v263_v17  ;;  %v247_v33 = vmax.f32 %v245_v10, %v246_v18  ;;  %v275_v36 = vmax.f32 %v273_v11, %v274_v19 }
  0xf1   :  { %v295_v37 = vmul.f32 1.442695, %v286_v20  ;;  %v303_v38 = vmul.f32 1.442695, %v290_v21  ;;  %v256_v39 = vmax.f32 %v254_v14, %v255_v22  ;;  %v284_v40 = vmax.f32 %v282_v15, %v283_v23 }
  0xf2   :  { %v293_v41 = vmul.f32 1.442695, %v285_v24  ;;  %v301_v42 = vmul.f32 1.442695, %v289_v32  ;;  %v248_v43 = vrot.slane %v247_v33, 1  ;;  %v276_v46 = vrot.slane %v275_v36, 1 }
  0xf3   :  { %1693 = vpow2.f32 %v295_v37  ;;  %v288_v47 = vsub.f32 %v1892_v44, %v256_v39  ;;  %v292_v30 = vsub.f32 %v1894_v45, %v284_v40 }
  0xf4   :  { %1695 = vpow2.f32 %v303_v38  ;;  %v249_v31 = vmax.f32 %v247_v33, %v248_v43  ;;  %v277_v48 = vmax.f32 %v275_v36, %v276_v46 }
  0xf5   :  { %1697 = vpow2.f32 %v293_v41  ;;  %v299_v34 = vmul.f32 1.442695, %v288_v47  ;;  %v307_v35 = vmul.f32 1.442695, %v292_v30 }
  0xf6   :  { %1699 = vpow2.f32 %v301_v42  ;;  %v287_v49 = vsub.f32 %v1900_v50, %v249_v31  ;;  %v291_v52 = vsub.f32 %v1902_v51, %v277_v48 }
  0xf7   :  { %1701 = vpow2.f32 %v299_v34 }
  0xf8   :  { %1703 = vpow2.f32 %v307_v35  ;;  %v297_v53 = vmul.f32 1.442695, %v287_v49  ;;  %v305_v54 = vmul.f32 1.442695, %v291_v52  ;;  %v66_v35 = vpop.permute.xlu1 %65 }
  0xfa   :  { %1705 = vpow2.f32 %v297_v53 }
  0xfb   :  { %1707 = vpow2.f32 %v305_v54 }
  0xfd   :  { %v1912_v44 = vpop.eup %1693 }
  0xfe   :  { %v1914_v45 = vpop.eup %1695  ;;  %v316_v55 = vsel %vm228_vm2, %v1912_v44, 0.0 }
  0xff   :  { %v1918_v56 = vpop.eup %1697  ;;  %v317_v57 = vrot.slane %v316_v55, 4  ;;  %v344_v50 = vsel %vm228_vm2, %v1914_v45, 0.0 }
 0x100   :  { %v1922_v51 = vpop.eup %1699  ;;  %v309_v58 = vsel %vm228_vm2, %v1918_v56, 0.0  ;;  %v345_v59 = vrot.slane %v344_v50, 4 }
 0x101   :  { %v1926_v60 = vpop.eup %1701  ;;  %v310_v61 = vrot.slane %v309_v58, 4  ;;  %v318_v62 = vadd.f32 %v317_v57, %v316_v55  ;;  %v337_v63 = vsel %vm228_vm2, %v1922_v51, 0.0 }
 0x102   :  { %v1930_v0 = vpop.eup %1703  ;;  %v338_v1 = vrot.slane %v337_v63, 4  ;;  %v330_v2 = vsel %vm228_vm2, %v1926_v60, 0.0  ;;  %v346_v3 = vadd.f32 %v345_v59, %v344_v50 }
 0x103   :  { %v311_v4 = vadd.f32 %v310_v61, %v309_v58  ;;  %v319_v5 = vrot.slane %v318_v62, 2  ;;  %v331_v6 = vrot.slane %v330_v2, 4  ;;  %v358_v7 = vsel %vm228_vm2, %v1930_v0, 0.0 }
 0x104   :  { %v1936_v8 = vpop.eup %1705  ;;  %v339_v9 = vadd.f32 %v338_v1, %v337_v63  ;;  %v347_v10 = vrot.slane %v346_v3, 2  ;;  %v359_v11 = vrot.slane %v358_v7, 4 }
 0x105   :  { %v1938_v12 = vpop.eup %1707  ;;  %v323_v13 = vsel %vm228_vm2, %v1936_v8, 0.0  ;;  %v312_v14 = vrot.slane %v311_v4, 2  ;;  %v320_v15 = vadd.f32 %v319_v5, %v318_v62  ;;  %v332_v16 = vadd.f32 %v331_v6, %v330_v2  ;;  %v71_v62 = vpop.permute.xlu1 %70 }
 0x106   :  { %v324_v17 = vrot.slane %v323_v13, 4  ;;  %v351_v18 = vsel %vm228_vm2, %v1938_v12, 0.0  ;;  %v340_v19 = vrot.slane %v339_v9, 2  ;;  %v348_v20 = vadd.f32 %v347_v10, %v346_v3 }
 0x107   :  { %v352_v21 = vrot.slane %v351_v18, 4  ;;  %v313_v22 = vadd.f32 %v312_v14, %v311_v4  ;;  %v321_v23 = vrot.slane %v320_v15, 1  ;;  %v333_v24 = vrot.slane %v332_v16, 2 }
 0x108   :  { %v341_v32 = vadd.f32 %v340_v19, %v339_v9  ;;  %v325_v33 = vadd.f32 %v324_v17, %v323_v13  ;;  %v349_v36 = vrot.slane %v348_v20, 1  ;;  %v360_v37 = vadd.f32 %v359_v11, %v358_v7 }
 0x109   :  { %v314_v38 = vrot.slane %v313_v22, 1  ;;  %v322_v39 = vadd.f32 %v321_v23, %v320_v15  ;;  %v353_v40 = vadd.f32 %v352_v21, %v351_v18  ;;  %v334_v41 = vadd.f32 %v333_v24, %v332_v16  ;;  %v81_v9 = vpop.permute.xlu1 %80 }
 0x10a   :  { %v342_v42 = vrot.slane %v341_v32, 1  ;;  %v326_v43 = vrot.slane %v325_v33, 2  ;;  %v350_v46 = vadd.f32 %v349_v36, %v348_v20  ;;  %v361_v47 = vrot.slane %v360_v37, 2 }
 0x10b   :  { %v315_v30 = vadd.f32 %v314_v38, %v313_v22  ;;  %1709 = vrcp.f32 %v322_v39  ;;  %v354_v31 = vrot.slane %v353_v40, 2  ;;  %v335_v48 = vrot.slane %v334_v41, 1 }
 0x10c   :  { %v343_v34 = vadd.f32 %v342_v42, %v341_v32  ;;  %v327_v49 = vadd.f32 %v326_v43, %v325_v33  ;;  %1711 = vrcp.f32 %v350_v46  ;;  %v362_v52 = vadd.f32 %v361_v47, %v360_v37 }
 0x10d   :  { %1713 = vrcp.f32 %v315_v30  ;;  %v355_v53 = vadd.f32 %v354_v31, %v353_v40  ;;  %v336_v54 = vadd.f32 %v335_v48, %v334_v41  ;;  %v692_v41 = vlaneseq }
 0x10e   :  { %1715 = vrcp.f32 %v343_v34  ;;  %v328_v55 = vrot.slane %v327_v49, 1  ;;  %v363_v57 = vrot.slane %v362_v52, 1 }
 0x10f   :  { %v356_v50 = vrot.slane %v355_v53, 1  ;;  %1717 = vrcp.f32 %v336_v54  ;;  %v2034_v42 = vshrl.u32 %v692_v41, 7 }
 0x110   :  { %v329_v58 = vadd.f32 %v328_v55, %v327_v49  ;;  %v364_v59 = vadd.f32 %v363_v57, %v362_v52 }
 0x111   :  { %v357_v61 = vadd.f32 %v356_v50, %v355_v53  ;;  %v2040_v31 = vsub.s32 0, %v2034_v42  ;;  %v706_v55 = vsub.s32 3, %v2034_v42  ;;  %v702_v57 = vsub.s32 2, %v2034_v42 }
 0x112   :  { %1719 = vrcp.f32 %v329_v58 }
 0x113   :  { %1721 = vrcp.f32 %v357_v61 }
 0x114   :  { %1723 = vrcp.f32 %v364_v59 }
 0x115   :  { %v1710_v63 = vpop.eup %1709 }
 0x116   :  { %v1712_v1 = vpop.eup %1711  ;;  %v374_v2 = vmul.f32 0.5, %v1710_v63  ;;  %v710_v63 = vsub.s32 4, %v2034_v42 }
 0x117   :  { %v1714_v3 = vpop.eup %1713  ;;  %v378_v4 = vmul.f32 0.5, %v1712_v1 }
 0x118   :  { %v1716_v5 = vpop.eup %1715  ;;  %v373_v6 = vmul.f32 0.5, %v1714_v3  ;;  %v382_v7 = vmul.f32 %v1912_v44, %v374_v2 }
 0x119   :  { %v1718_v10 = vpop.eup %1717  ;;  %v377_v11 = vmul.f32 0.5, %v1716_v5  ;;  %v386_v13 = vmul.f32 %v1914_v45, %v378_v4 }
 0x11a   :  { %v381_v14 = vmul.f32 %v1918_v56, %v373_v6  ;;  %v1948_v15 = vadd.f32 %v382_v7, %v1875_v26  ;;  %v376_v16 = vmul.f32 0.5, %v1718_v10 }
 0x11b   :  { %v385_v17 = vmul.f32 %v1922_v51, %v377_v11  ;;  %v1951_v18 = vadd.f32 %v386_v13, %v81_v9 }
 0x11c   :  { %v1720_v19 = vpop.eup %1719  ;;  %v1954_v20 = vadd.f32 %v381_v14, %v1873_v25  ;;  %v384_v44 = vmul.f32 %v1926_v60, %v376_v16  ;;  %420 = vrot.lane.b32.xlu0 %v1948_v15, %s1766_s2  ;;  %v91_v60 = vpop.permute.xlu1 %90  ;;  %v722_v14 = vsub.s32 7, %v2034_v42 }
 0x11d   :  { %v1722_v45 = vpop.eup %1721  ;;  %v1959_v56 = vadd.f32 %v385_v17, %v1877_v27  ;;  %v375_v26 = vmul.f32 0.5, %v1720_v19 }
 0x11e   :  { %v1724_v21 = vpop.eup %1723  ;;  %v379_v22 = vmul.f32 0.5, %v1722_v45  ;;  %v1961_v23 = vadd.f32 %v384_v44, %v71_v62  ;;  %418 = vrot.lane.b32.xlu1 %v1954_v20, %s1766_s2  ;;  %v714_v62 = vsub.s32 5, %v2034_v42 }
 0x11f   :  { %v383_v51 = vmul.f32 %v1936_v8, %v375_v26  ;;  %v380_v25 = vmul.f32 0.5, %v1724_v21 }
 0x120   :  { %v387_v24 = vmul.f32 %v1938_v12, %v379_v22  ;;  %424 = vrot.lane.b32.xlu0 %v1961_v23, %s1766_s2 }
 0x121   :  { %v1967_v32 = vadd.f32 %v383_v51, %v66_v35  ;;  %v388_v27 = vmul.f32 %v1930_v0, %v380_v25 }
 0x122   :  { %v1971_v33 = vadd.f32 %v387_v24, %v1879_v28  ;;  %v673_v28 = vrot.slane %v1881_v29, 4 }
 0x123   :  { %v1973_v36 = vadd.f32 %v388_v27, %v91_v60  ;;  %422 = vrot.lane.b32.xlu1 %v1967_v32, %s1766_s2 }
 0x124   :  { %428 = vrot.lane.b32.xlu0 %v1951_v18, %s1766_s2  ;;  %v674_v0 = vmax.f32 %v1881_v29, %v673_v28 }
 0x126   :  { %v675_v8 = vrot.slane %v674_v0, 2 }
 0x127   :  { %426 = vrot.lane.b32.xlu1 %v1959_v56, %s1766_s2 }
 0x128   :  { %432 = vrot.lane.b32.xlu0 %v1973_v36, %s1766_s2  ;;  %v676_v12 = vmax.f32 %v674_v0, %v675_v8 }
 0x12a   :  { %v677_v37 = vrot.slane %v676_v12, 1 }
 0x12b   :  { %430 = vrot.lane.b32.xlu1 %v1971_v33, %s1766_s2 }
 0x12c   :  { %455 = vrot.lane.b32.xlu0 %v1948_v15, %s1767_s6  ;;  %v2023_v38 = vmax.f32 %v676_v12, %v677_v37 }
 0x12e   :  { %v679_v39 = vsub.f32 %v1881_v29, %v2023_v38  ;;  %v698_v29 = vsub.s32 1, %v2034_v42 }
 0x12f   :  { %453 = vrot.lane.b32.xlu1 %v1954_v20, %s1767_s6 }
 0x130   :  { %459 = vrot.lane.b32.xlu0 %v1961_v23, %s1767_s6  ;;  %v680_v40 = vmul.f32 1.442695, %v679_v39 }
 0x132   :  { %1725 = vpow2.f32 %v680_v40 }
 0x133   :  { %457 = vrot.lane.b32.xlu1 %v1967_v32, %s1767_s6 }
 0x134   :  { %463 = vrot.lane.b32.xlu0 %v1951_v18, %s1767_s6 }
 0x137   :  { %461 = vrot.lane.b32.xlu1 %v1959_v56, %s1767_s6 }
 0x138   :  { %467 = vrot.lane.b32.xlu0 %v1973_v36, %s1767_s6 }
 0x13b   :  { %465 = vrot.lane.b32.xlu1 %v1971_v33, %s1767_s6 }
 0x13c   :  { %490 = vrot.lane.b32.xlu0 %v1948_v15, %s1768_s7  ;;  %v1726_v30 = vpop.eup %1725 }
 0x13d   :  { %v699_v34 = vrot.slane %v1726_v30, %v698_v29  ;;  %v695_v52 = vrot.slane %v1726_v30, %v2040_v31  ;;  %v707_v3 = vrot.slane %v1726_v30, %v706_v55  ;;  %v703_v4 = vrot.slane %v1726_v30, %v702_v57 }
 0x13e   :  { %v715_v16 = vrot.slane %v1726_v30, %v714_v62  ;;  %v711_v17 = vrot.slane %v1726_v30, %v710_v63  ;;  %v723_v25 = vrot.slane %v1726_v30, %v722_v14 }
 0x13f   :  { %488 = vrot.lane.b32.xlu1 %v1954_v20, %s1768_s7 }
 0x140   :  { %494 = vrot.lane.b32.xlu0 %v1961_v23, %s1768_s7 }
 0x143   :  { %492 = vrot.lane.b32.xlu1 %v1967_v32, %s1768_s7 }
 0x144   :  { %498 = vrot.lane.b32.xlu0 %v1951_v18, %s1768_s7 }
 0x147   :  { %496 = vrot.lane.b32.xlu1 %v1959_v56, %s1768_s7 }
 0x148   :  { %502 = vrot.lane.b32.xlu0 %v1973_v36, %s1768_s7 }
 0x14b   :  { %500 = vrot.lane.b32.xlu1 %v1971_v33, %s1768_s7 }
 0x14c   :  { %525 = vrot.lane.b32.xlu0 %v1948_v15, %s1769_s8 }
 0x14f   :  { %523 = vrot.lane.b32.xlu1 %v1954_v20, %s1769_s8 }
 0x150   :  { %529 = vrot.lane.b32.xlu0 %v1961_v23, %s1769_s8 }
 0x153   :  { %527 = vrot.lane.b32.xlu1 %v1967_v32, %s1769_s8 }
 0x154   :  { %533 = vrot.lane.b32.xlu0 %v1951_v18, %s1769_s8 }
 0x157   :  { %531 = vrot.lane.b32.xlu1 %v1959_v56, %s1769_s8 }
 0x158   :  { %537 = vrot.lane.b32.xlu0 %v1973_v36, %s1769_s8 }
 0x15b   :  { %535 = vrot.lane.b32.xlu1 %v1971_v33, %s1769_s8 }
 0x15c   :  { %560 = vrot.lane.b32.xlu0 %v1948_v15, %s1770_s9 }
 0x15f   :  { %558 = vrot.lane.b32.xlu1 %v1954_v20, %s1770_s9 }
 0x160   :  { %564 = vrot.lane.b32.xlu0 %v1961_v23, %s1770_s9 }
 0x163   :  { %562 = vrot.lane.b32.xlu1 %v1967_v32, %s1770_s9 }
 0x164   :  { %568 = vrot.lane.b32.xlu0 %v1951_v18, %s1770_s9 }
 0x167   :  { %566 = vrot.lane.b32.xlu1 %v1959_v56, %s1770_s9 }
 0x168   :  { %572 = vrot.lane.b32.xlu0 %v1973_v36, %s1770_s9 }
 0x16b   :  { %570 = vrot.lane.b32.xlu1 %v1971_v33, %s1770_s9 }
 0x16c   :  { %595 = vrot.lane.b32.xlu0 %v1948_v15, %s1771_s10 }
 0x16f   :  { %593 = vrot.lane.b32.xlu1 %v1954_v20, %s1771_s10 }
 0x170   :  { %599 = vrot.lane.b32.xlu0 %v1961_v23, %s1771_s10 }
 0x173   :  { %597 = vrot.lane.b32.xlu1 %v1967_v32, %s1771_s10 }
 0x174   :  { %603 = vrot.lane.b32.xlu0 %v1951_v18, %s1771_s10 }
 0x177   :  { %601 = vrot.lane.b32.xlu1 %v1959_v56, %s1771_s10 }
 0x178   :  { %607 = vrot.lane.b32.xlu0 %v1973_v36, %s1771_s10 }
 0x17b   :  { %605 = vrot.lane.b32.xlu1 %v1971_v33, %s1771_s10 }
 0x17c   :  { %630 = vrot.lane.b32.xlu0 %v1948_v15, %s1772_s0 }
 0x17f   :  { %628 = vrot.lane.b32.xlu1 %v1954_v20, %s1772_s0 }
 0x180   :  { %634 = vrot.lane.b32.xlu0 %v1961_v23, %s1772_s0 }
 0x183   :  { %632 = vrot.lane.b32.xlu1 %v1967_v32, %s1772_s0 }
 0x184   :  { %638 = vrot.lane.b32.xlu0 %v1951_v18, %s1772_s0  ;;  %v718_v18 = vsub.s32 6, %v2034_v42 }
 0x186   :  { %v719_v24 = vrot.slane %v1726_v30, %v718_v18 }
 0x187   :  { %636 = vrot.lane.b32.xlu1 %v1959_v56, %s1772_s0 }
 0x188   :  { %642 = vrot.lane.b32.xlu0 %v1973_v36, %s1772_s0 }
 0x18b   :  { %640 = vrot.lane.b32.xlu1 %v1971_v33, %s1772_s0 }
 0x18e   :  { %v421_v43 = vpop.permute.xlu0 %420 }
 0x18f   :  { %445 = vst.msk [vmem:[#allocation2 + $0x48] sm:$0xff] %vm400_vm1, %v421_v43 }
 0x190   :  { %v419_v46 = vpop.permute.xlu1 %418 }
 0x191   :  { %444 = vst.msk [vmem:[#allocation2 + $0x40] sm:$0xff] %vm400_vm1, %v419_v46 }
 0x192   :  { %v425_v47 = vpop.permute.xlu0 %424 }
 0x193   :  { %447 = vst.msk [vmem:[#allocation2 + $0x58] sm:$0xff] %vm400_vm1, %v425_v47 }
 0x195   :  { %v423_v48 = vpop.permute.xlu1 %422 }
 0x196   :  { %v684_v35 = vld [vmem:[#allocation2 + $0x48] sm:$0xff]  ;;  %446 = vst.msk [vmem:[#allocation2 + $0x50] sm:$0xff] %vm400_vm1, %v423_v48  ;;  %v429_v49 = vpop.permute.xlu0 %428 }
 0x197   :  { %449 = vst.msk [vmem:[#allocation2 + $0x68] sm:$0xff] %vm400_vm1, %v429_v49  ;;  %v733_v53 = vmul.f32 %v699_v34, %v684_v35 }
 0x198   :  { %v683_v54 = vld [vmem:[#allocation2 + $0x40] sm:$0xff] }
 0x199   :  { %v732_v50 = vmul.f32 %v695_v52, %v683_v54  ;;  %v427_v58 = vpop.permute.xlu1 %426  ;;  %v741_v1 = vsel %vm400_vm1, %v733_v53, 0.0 }
 0x19a   :  { %448 = vst.msk [vmem:[#allocation2 + $0x60] sm:$0xff] %vm400_vm1, %v427_v58  ;;  %v433_v59 = vpop.permute.xlu0 %432  ;;  %v686_v61 = vld [vmem:[#allocation2 + $0x58] sm:$0xff] }
 0x19b   :  { %451 = vst.msk [vmem:[#allocation2 + $0x78] sm:$0xff] %vm400_vm1, %v433_v59  ;;  %v740_v2 = vsel %vm400_vm1, %v732_v50, 0.0  ;;  %v735_v7 = vmul.f32 %v707_v3, %v686_v61 }
 0x19c   :  { %v742_v11 = vadd.f32 %v741_v1, %v740_v2  ;;  %v1773_v1 = vmov 1966171168  }
 0x19d   :  { %v685_v5 = vld [vmem:[#allocation2 + $0x50] sm:$0xff]  ;;  %v431_v6 = vpop.permute.xlu1 %430  ;;  %v745_v45 = vsel %vm400_vm1, %v735_v7, 0.0  ;;  %v785_v2 = vunpack.c.l.s4 %v1773_v1 }
 0x19e   :  { %v734_v9 = vmul.f32 %v703_v4, %v685_v5  ;;  %450 = vst.msk [vmem:[#allocation2 + $0x70] sm:$0xff] %vm400_vm1, %v431_v6  ;;  %v456_v10 = vpop.permute.xlu0 %455  ;;  %v688_v13 = vld [vmem:[#allocation2 + $0x68] sm:$0xff] }
 0x19f   :  { %480 = vst.msk [vmem:[#allocation2 + $0x88] sm:$0xff] %vm400_vm1, %v456_v10  ;;  %v737_v56 = vmul.f32 %v715_v16, %v688_v13  ;;  %v786_v5 = vunpack.c.0.s8 %v785_v2 }
 0x1a0   :  { %v743_v15 = vsel %vm400_vm1, %v734_v9, 0.0 }
 0x1a1   :  { %v744_v19 = vadd.f32 %v743_v15, %v742_v11  ;;  %v687_v20 = vld [vmem:[#allocation2 + $0x60] sm:$0xff]  ;;  %v454_v44 = vpop.permute.xlu1 %453  ;;  %v749_v33 = vsel %vm400_vm1, %v737_v56, 0.0  ;;  %v2089_v9 = vsub.s32 %v786_v5, %v2034_v42 }
 0x1a2   :  { %v736_v26 = vmul.f32 %v711_v17, %v687_v20  ;;  %479 = vst.msk [vmem:[#allocation2 + $0x80] sm:$0xff] %vm400_vm1, %v454_v44  ;;  %v460_v21 = vpop.permute.xlu0 %459  ;;  %v690_v23 = vld [vmem:[#allocation2 + $0x78] sm:$0xff] }
 0x1a3   :  { %v746_v22 = vadd.f32 %v745_v45, %v744_v19  ;;  %482 = vst.msk [vmem:[#allocation2 + $0x98] sm:$0xff] %vm400_vm1, %v460_v21  ;;  %v739_v36 = vmul.f32 %v723_v25, %v690_v23 }
 0x1a4   :  { %v747_v51 = vsel %vm400_vm1, %v736_v26, 0.0 }
 0x1a5   :  { %v748_v60 = vadd.f32 %v747_v51, %v746_v22  ;;  %v689_v32 = vld [vmem:[#allocation2 + $0x70] sm:$0xff]  ;;  %v458_v27 = vpop.permute.xlu1 %457  ;;  %v753_v40 = vsel %vm400_vm1, %v739_v36, 0.0 }
 0x1a6   :  { %v738_v28 = vmul.f32 %v719_v24, %v689_v32  ;;  %481 = vst.msk [vmem:[#allocation2 + $0x90] sm:$0xff] %vm400_vm1, %v458_v27  ;;  %v464_v0 = vpop.permute.xlu0 %463  ;;  %v775_v27 = vld [vmem:[#allocation2 + $0x88] sm:$0xff] }
 0x1a7   :  { %v750_v8 = vadd.f32 %v749_v33, %v748_v60  ;;  %484 = vst.msk [vmem:[#allocation2 + $0xa8] sm:$0xff] %vm400_vm1, %v464_v0 }
 0x1a8   :  { %v751_v12 = vsel %vm400_vm1, %v738_v28, 0.0 }
 0x1a9   :  { %v752_v37 = vadd.f32 %v751_v12, %v750_v8  ;;  %v462_v39 = vpop.permute.xlu1 %461  ;;  %v774_v22 = vld [vmem:[#allocation2 + $0x80] sm:$0xff] }
 0x1aa   :  { %483 = vst.msk [vmem:[#allocation2 + $0xa0] sm:$0xff] %vm400_vm1, %v462_v39  ;;  %v468_v41 = vpop.permute.xlu0 %467 }
 0x1ab   :  { %v754_v43 = vadd.f32 %v753_v40, %v752_v37  ;;  %486 = vst.msk [vmem:[#allocation2 + $0xb8] sm:$0xff] %vm400_vm1, %v468_v41  ;;  %v777_v41 = vld [vmem:[#allocation2 + $0x98] sm:$0xff] }
 0x1ad   :  { %v755_v46 = vmax.f32 %v754_v43, 1.1754944e-38  ;;  %v466_v29 = vpop.permute.xlu1 %465  ;;  %v776_v33 = vld [vmem:[#allocation2 + $0x90] sm:$0xff] }
 0x1ae   :  { %485 = vst.msk [vmem:[#allocation2 + $0xb0] sm:$0xff] %vm400_vm1, %v466_v29  ;;  %v491_v47 = vpop.permute.xlu0 %490 }
 0x1af   :  { %1727 = vlog2.f32 %v755_v46  ;;  %v761_v30 = vsel %vm400_vm1, %v755_v46, -inf  ;;  %515 = vst.msk [vmem:[#allocation2 + $0xc8] sm:$0xff] %vm400_vm1, %v491_v47 }
 0x1b0   :  { %v762_v48 = vrot.slane %v761_v30, 4 }
 0x1b1   :  { %v489_v34 = vpop.permute.xlu1 %488 }
 0x1b2   :  { %v763_v35 = vmax.f32 %v761_v30, %v762_v48  ;;  %514 = vst.msk [vmem:[#allocation2 + $0xc0] sm:$0xff] %vm400_vm1, %v489_v34  ;;  %v495_v49 = vpop.permute.xlu0 %494  ;;  %v778_v34 = vld [vmem:[#allocation2 + $0xa0] sm:$0xff] }
 0x1b3   :  { %517 = vst.msk [vmem:[#allocation2 + $0xd8] sm:$0xff] %vm400_vm1, %v495_v49 }
 0x1b4   :  { %v764_v52 = vrot.slane %v763_v35, 2 }
 0x1b5   :  { %v493_v53 = vpop.permute.xlu1 %492 }
 0x1b6   :  { %v765_v54 = vmax.f32 %v763_v35, %v764_v52  ;;  %516 = vst.msk [vmem:[#allocation2 + $0xd0] sm:$0xff] %vm400_vm1, %v493_v53  ;;  %v499_v55 = vpop.permute.xlu0 %498 }
 0x1b7   :  { %519 = vst.msk [vmem:[#allocation2 + $0xe8] sm:$0xff] %vm400_vm1, %v499_v55  ;;  %v779_v55 = vld [vmem:[#allocation2 + $0xa8] sm:$0xff] }
 0x1b8   :  { %v766_v57 = vrot.slane %v765_v54, 1 }
 0x1b9   :  { %v1728_v50 = vpop.eup %1727  ;;  %v497_v58 = vpop.permute.xlu1 %496 }
 0x1ba   :  { %v757_v59 = vmul.f32 0.6931472, %v1728_v50  ;;  %v767_v61 = vmax.f32 %v765_v54, %v766_v57  ;;  %518 = vst.msk [vmem:[#allocation2 + $0xe0] sm:$0xff] %vm400_vm1, %v497_v58  ;;  %v503_v62 = vpop.permute.xlu0 %502 }
 0x1bb   :  { %521 = vst.msk [vmem:[#allocation2 + $0xf8] sm:$0xff] %vm400_vm1, %v503_v62  ;;  %v780_v62 = vld [vmem:[#allocation2 + $0xb0] sm:$0xff] }
 0x1bc   :  { %v758_v63 = vadd.f32 %v757_v59, %v2023_v38  ;;  %1729 = vrcp.f32 %v767_v61 }
 0x1bd   :  { %v501_v3 = vpop.permute.xlu1 %500 }
 0x1be   :  { %1626 = vst.msk [vmem:[%s2310_s4 + $0x8] sm:$0xff] %vm400_vm1, %v758_v63  ;;  %520 = vst.msk [vmem:[#allocation2 + $0xf0] sm:$0xff] %vm400_vm1, %v501_v3  ;;  %v526_v4 = vpop.permute.xlu0 %525 }
 0x1bf   :  { %550 = vst.msk [vmem:[#allocation2 + $0x108] sm:$0xff] %vm400_vm1, %v526_v4  ;;  %v781_v4 = vld [vmem:[#allocation2 + $0xb8] sm:$0xff] }
 0x1c1   :  { %v524_v6 = vpop.permute.xlu1 %523 }
 0x1c2   :  { %549 = vst.msk [vmem:[#allocation2 + $0x100] sm:$0xff] %vm400_vm1, %v524_v6  ;;  %v530_v7 = vpop.permute.xlu0 %529 }
 0x1c3   :  { %552 = vst.msk [vmem:[#allocation2 + $0x118] sm:$0xff] %vm400_vm1, %v530_v7 }
 0x1c5   :  { %v528_v10 = vpop.permute.xlu1 %527 }
 0x1c6   :  { %v2091_v11 = vpop.eup %1729  ;;  %551 = vst.msk [vmem:[#allocation2 + $0x110] sm:$0xff] %vm400_vm1, %v528_v10  ;;  %v534_v13 = vpop.permute.xlu0 %533 }
 0x1c7   :  { %v772_v14 = vmul.f32 %v2091_v11, %v755_v46  ;;  %554 = vst.msk [vmem:[#allocation2 + $0x128] sm:$0xff] %vm400_vm1, %v534_v13  ;;  %1731 = vlog2.f32 %v2091_v11 }
 0x1c9   :  { %v790_v15 = vrot.slane %v772_v14, %v2089_v9  ;;  %v783_v16 = vcombine.high %v772_v14, %v772_v14  ;;  %v532_v17 = vpop.permute.xlu1 %531 }
 0x1ca   :  { %553 = vst.msk [vmem:[#allocation2 + $0x120] sm:$0xff] %vm400_vm1, %v532_v17  ;;  %v538_v18 = vpop.permute.xlu0 %537 }
 0x1cb   :  { %v798_v19 = vcombine.high %v790_v15, %v790_v15  ;;  %v806_v42 = vrot.slane %v790_v15, %v2089_v9  ;;  %v797_v20 = vrot.slane %v783_v16, %v2089_v9  ;;  %556 = vst.msk [vmem:[#allocation2 + $0x138] sm:$0xff] %vm400_vm1, %v538_v18 }
 0x1cd   :  { %v820_v44 = vrot.slane %v798_v19, %v2089_v9  ;;  %v835_v45 = vrot.slane %v806_v42, %v2040_v31  ;;  %v828_v56 = vcombine.high %v806_v42, %v806_v42  ;;  %v799_v26 = vcombine.high %v797_v20, %v797_v20  ;;  %v536_v21 = vpop.permute.xlu1 %535 }
 0x1ce   :  { %v813_v23 = vrot.slane %v797_v20, %v2089_v9  ;;  %555 = vst.msk [vmem:[#allocation2 + $0x130] sm:$0xff] %vm400_vm1, %v536_v21  ;;  %v561_v51 = vpop.permute.xlu0 %560 }
 0x1cf   :  { %v839_v25 = vrot.slane %v820_v44, %v2040_v31  ;;  %v872_v24 = vmul.f32 %v835_v45, %v774_v22  ;;  %v830_v60 = vcombine.high %v820_v44, %v820_v44  ;;  %v843_v32 = vrot.slane %v828_v56, %v2040_v31  ;;  %585 = vst.msk [vmem:[#allocation2 + $0x148] sm:$0xff] %vm400_vm1, %v561_v51 }
 0x1d0   :  { %v827_v36 = vrot.slane %v799_v26, %v2089_v9  ;;  %v851_v28 = vrot.slane %v813_v23, %v2040_v31  ;;  %v829_v37 = vcombine.high %v813_v23, %v813_v23 }
 0x1d1   :  { %v873_v0 = vmul.f32 %v839_v25, %v775_v27  ;;  %v847_v8 = vrot.slane %v830_v60, %v2040_v31  ;;  %v874_v12 = vmul.f32 %v843_v32, %v776_v33  ;;  %v559_v39 = vpop.permute.xlu1 %558  ;;  %v880_v40 = vsel %vm400_vm1, %v872_v24, 0.0  ;;  %v1732_v21 = vpop.eup %1731 }
 0x1d2   :  { %584 = vst.msk [vmem:[#allocation2 + $0x140] sm:$0xff] %vm400_vm1, %v559_v39  ;;  %v565_v43 = vpop.permute.xlu0 %564  ;;  %v855_v47 = vrot.slane %v827_v36, %v2040_v31  ;;  %v831_v30 = vcombine.high %v827_v36, %v827_v36  ;;  %v876_v49 = vmul.f32 %v851_v28, %v778_v34  ;;  %v859_v52 = vrot.slane %v829_v37, %v2040_v31 }
 0x1d3   :  { %v881_v46 = vsel %vm400_vm1, %v873_v0, 0.0  ;;  %v875_v29 = vmul.f32 %v847_v8, %v777_v41  ;;  %587 = vst.msk [vmem:[#allocation2 + $0x158] sm:$0xff] %vm400_vm1, %v565_v43  ;;  %v883_v35 = vsel %vm400_vm1, %v874_v12, 0.0  ;;  %v770_v25 = vmul.f32 0.6931472, %v1732_v21 }
 0x1d4   :  { %v882_v48 = vadd.f32 %v881_v46, %v880_v40  ;;  %v877_v58 = vmul.f32 %v855_v47, %v779_v55  ;;  %v863_v59 = vrot.slane %v831_v30, %v2040_v31  ;;  %v887_v63 = vsel %vm400_vm1, %v876_v49, 0.0  ;;  %v914_v55 = vld [vmem:[#allocation2 + $0xc0] sm:$0xff] }
 0x1d5   :  { %v563_v53 = vpop.permute.xlu1 %562  ;;  %v885_v50 = vsel %vm400_vm1, %v875_v29, 0.0  ;;  %v878_v1 = vmul.f32 %v859_v52, %v780_v62  ;;  %v2140_v36 = vsub.f32 %v2023_v38, %v770_v25  ;;  %v915_v62 = vld [vmem:[#allocation2 + $0xc8] sm:$0xff] }
 0x1d6   :  { %v884_v54 = vadd.f32 %v883_v35, %v882_v48  ;;  %586 = vst.msk [vmem:[#allocation2 + $0x150] sm:$0xff] %vm400_vm1, %v563_v53  ;;  %v569_v57 = vpop.permute.xlu0 %568  ;;  %v889_v6 = vsel %vm400_vm1, %v877_v58, 0.0  ;;  %v879_v7 = vmul.f32 %v863_v59, %v781_v4 }
 0x1d7   :  { %589 = vst.msk [vmem:[#allocation2 + $0x168] sm:$0xff] %vm400_vm1, %v569_v57  ;;  %v891_v13 = vsel %vm400_vm1, %v878_v1, 0.0 }
 0x1d8   :  { %v886_v61 = vadd.f32 %v885_v50, %v884_v54  ;;  %v893_v17 = vsel %vm400_vm1, %v879_v7, 0.0 }
 0x1d9   :  { %v567_v2 = vpop.permute.xlu1 %566 }
 0x1da   :  { %v888_v3 = vadd.f32 %v887_v63, %v886_v61  ;;  %588 = vst.msk [vmem:[#allocation2 + $0x160] sm:$0xff] %vm400_vm1, %v567_v2  ;;  %v573_v5 = vpop.permute.xlu0 %572  ;;  %v916_v63 = vld [vmem:[#allocation2 + $0xd0] sm:$0xff] }
 0x1db   :  { %591 = vst.msk [vmem:[#allocation2 + $0x178] sm:$0xff] %vm400_vm1, %v573_v5 }
 0x1dc   :  { %v890_v10 = vadd.f32 %v889_v6, %v888_v3 }
 0x1dd   :  { %v571_v14 = vpop.permute.xlu1 %570 }
 0x1de   :  { %v892_v15 = vadd.f32 %v891_v13, %v890_v10  ;;  %590 = vst.msk [vmem:[#allocation2 + $0x170] sm:$0xff] %vm400_vm1, %v571_v14  ;;  %v596_v16 = vpop.permute.xlu0 %595  ;;  %v917_v10 = vld [vmem:[#allocation2 + $0xd8] sm:$0xff] }
 0x1df   :  { %620 = vst.msk [vmem:[#allocation2 + $0x188] sm:$0xff] %vm400_vm1, %v596_v16 }
 0x1e0   :  { %v894_v18 = vadd.f32 %v893_v17, %v892_v15 }
 0x1e1   :  { %v594_v19 = vpop.permute.xlu1 %593 }
 0x1e2   :  { %v895_v42 = vmax.f32 %v894_v18, 1.1754944e-38  ;;  %619 = vst.msk [vmem:[#allocation2 + $0x180] sm:$0xff] %vm400_vm1, %v594_v19  ;;  %v600_v20 = vpop.permute.xlu0 %599  ;;  %v918_v18 = vld [vmem:[#allocation2 + $0xe0] sm:$0xff] }
 0x1e3   :  { %622 = vst.msk [vmem:[#allocation2 + $0x198] sm:$0xff] %vm400_vm1, %v600_v20 }
 0x1e4   :  { %1733 = vlog2.f32 %v895_v42  ;;  %v901_v44 = vsel %vm400_vm1, %v895_v42, -inf }
 0x1e5   :  { %v902_v11 = vrot.slane %v901_v44, 4  ;;  %v598_v45 = vpop.permute.xlu1 %597 }
 0x1e6   :  { %621 = vst.msk [vmem:[#allocation2 + $0x190] sm:$0xff] %vm400_vm1, %v598_v45  ;;  %v604_v56 = vpop.permute.xlu0 %603 }
 0x1e7   :  { %v903_v26 = vmax.f32 %v901_v44, %v902_v11  ;;  %624 = vst.msk [vmem:[#allocation2 + $0x1a8] sm:$0xff] %vm400_vm1, %v604_v56  ;;  %v919_v11 = vld [vmem:[#allocation2 + $0xe8] sm:$0xff] }
 0x1e9   :  { %v904_v22 = vrot.slane %v903_v26, 2  ;;  %v602_v23 = vpop.permute.xlu1 %601 }
 0x1ea   :  { %623 = vst.msk [vmem:[#allocation2 + $0x1a0] sm:$0xff] %vm400_vm1, %v602_v23  ;;  %v608_v51 = vpop.permute.xlu0 %607 }
 0x1eb   :  { %v905_v24 = vmax.f32 %v903_v26, %v904_v22  ;;  %626 = vst.msk [vmem:[#allocation2 + $0x1b8] sm:$0xff] %vm400_vm1, %v608_v51  ;;  %v920_v22 = vld [vmem:[#allocation2 + $0xf0] sm:$0xff] }
 0x1ed   :  { %v906_v60 = vrot.slane %v905_v24, 1  ;;  %v606_v32 = vpop.permute.xlu1 %605 }
 0x1ee   :  { %v1734_v27 = vpop.eup %1733  ;;  %625 = vst.msk [vmem:[#allocation2 + $0x1b0] sm:$0xff] %vm400_vm1, %v606_v32  ;;  %v631_v33 = vpop.permute.xlu0 %630 }
 0x1ef   :  { %v897_v28 = vmul.f32 0.6931472, %v1734_v27  ;;  %v907_v0 = vmax.f32 %v905_v24, %v906_v60  ;;  %655 = vst.msk [vmem:[#allocation2 + $0x1c8] sm:$0xff] %vm400_vm1, %v631_v33  ;;  %v921_v24 = vld [vmem:[#allocation2 + $0xf8] sm:$0xff] }
 0x1f1   :  { %v898_v8 = vadd.f32 %v897_v28, %v2140_v36  ;;  %1735 = vrcp.f32 %v907_v0  ;;  %v629_v12 = vpop.permute.xlu1 %628 }
 0x1f2   :  { %654 = vst.msk [vmem:[#allocation2 + $0x1c0] sm:$0xff] %vm400_vm1, %v629_v12  ;;  %v635_v37 = vpop.permute.xlu0 %634 }
 0x1f3   :  { %1627 = vst.msk [vmem:[%s2310_s4 + $0x10] sm:$0xff] %vm400_vm1, %v898_v8  ;;  %657 = vst.msk [vmem:[#allocation2 + $0x1d8] sm:$0xff] %vm400_vm1, %v635_v37 }
 0x1f5   :  { %v633_v38 = vpop.permute.xlu1 %632 }
 0x1f6   :  { %656 = vst.msk [vmem:[#allocation2 + $0x1d0] sm:$0xff] %vm400_vm1, %v633_v38  ;;  %v639_v39 = vpop.permute.xlu0 %638 }
 0x1f7   :  { %659 = vst.msk [vmem:[#allocation2 + $0x1e8] sm:$0xff] %vm400_vm1, %v639_v39 }
 0x1f9   :  { %v637_v40 = vpop.permute.xlu1 %636 }
 0x1fa   :  { %658 = vst.msk [vmem:[#allocation2 + $0x1e0] sm:$0xff] %vm400_vm1, %v637_v40  ;;  %v643_v41 = vpop.permute.xlu0 %642 }
 0x1fb   :  { %v1736_v43 = vpop.eup %1735  ;;  %661 = vst.msk [vmem:[#allocation2 + $0x1f8] sm:$0xff] %vm400_vm1, %v643_v41 }
 0x1fc   :  { %v912_v46 = vmul.f32 %v1736_v43, %v895_v42  ;;  %1737 = vlog2.f32 %v1736_v43 }
 0x1fd   :  { %v641_v29 = vpop.permute.xlu1 %640 }
 0x1fe   :  { %v923_v47 = vcombine.high %v912_v46, %v912_v46  ;;  %v930_v30 = vrot.slane %v912_v46, %v2089_v9  ;;  %660 = vst.msk [vmem:[#allocation2 + $0x1f0] sm:$0xff] %vm400_vm1, %v641_v29 }
 0x200   :  { %v937_v48 = vrot.slane %v923_v47, %v2089_v9  ;;  %v938_v34 = vcombine.high %v930_v30, %v930_v30  ;;  %v946_v35 = vrot.slane %v930_v30, %v2089_v9 }
 0x202   :  { %v939_v49 = vcombine.high %v937_v48, %v937_v48  ;;  %v960_v52 = vrot.slane %v938_v34, %v2089_v9  ;;  %v975_v53 = vrot.slane %v946_v35, %v2040_v31  ;;  %v968_v54 = vcombine.high %v946_v35, %v946_v35 }
 0x203   :  { %v953_v57 = vrot.slane %v937_v48, %v2089_v9 }
 0x204   :  { %v979_v50 = vrot.slane %v960_v52, %v2040_v31  ;;  %v1012_v58 = vmul.f32 %v975_v53, %v914_v55  ;;  %v970_v59 = vcombine.high %v960_v52, %v960_v52  ;;  %v983_v61 = vrot.slane %v968_v54, %v2040_v31 }
 0x205   :  { %v967_v1 = vrot.slane %v939_v49, %v2089_v9  ;;  %v991_v2 = vrot.slane %v953_v57, %v2040_v31  ;;  %v969_v6 = vcombine.high %v953_v57, %v953_v57 }
 0x206   :  { %v1013_v3 = vmul.f32 %v979_v50, %v915_v62  ;;  %v987_v4 = vrot.slane %v970_v59, %v2040_v31  ;;  %v1014_v5 = vmul.f32 %v983_v61, %v916_v63  ;;  %v1020_v7 = vsel %vm400_vm1, %v1012_v58, 0.0  ;;  %v1738_v40 = vpop.eup %1737  ;;  %v1054_v62 = vld [vmem:[#allocation2 + $0x100] sm:$0xff] }
 0x207   :  { %v995_v15 = vrot.slane %v967_v1, %v2040_v31  ;;  %v971_v16 = vcombine.high %v967_v1, %v967_v1  ;;  %v1016_v42 = vmul.f32 %v991_v2, %v918_v18  ;;  %v999_v20 = vrot.slane %v969_v6, %v2040_v31  ;;  %v1056_v6 = vld [vmem:[#allocation2 + $0x110] sm:$0xff]  ;;  %v1057_v18 = vld [vmem:[#allocation2 + $0x118] sm:$0xff] }
 0x208   :  { %v1021_v13 = vsel %vm400_vm1, %v1013_v3, 0.0  ;;  %v1015_v14 = vmul.f32 %v987_v4, %v917_v10  ;;  %v1023_v19 = vsel %vm400_vm1, %v1014_v5, 0.0  ;;  %v910_v46 = vmul.f32 0.6931472, %v1738_v40  ;;  %v1055_v5 = vld [vmem:[#allocation2 + $0x108] sm:$0xff] }
 0x209   :  { %v1022_v17 = vadd.f32 %v1021_v13, %v1020_v7  ;;  %v1017_v56 = vmul.f32 %v995_v15, %v919_v11  ;;  %v1003_v26 = vrot.slane %v971_v16, %v2040_v31  ;;  %v1027_v23 = vsel %vm400_vm1, %v1016_v42, 0.0 }
 0x20a   :  { %v1025_v45 = vsel %vm400_vm1, %v1015_v14, 0.0  ;;  %v1018_v51 = vmul.f32 %v999_v20, %v920_v22  ;;  %v2179_v48 = vsub.f32 %v2140_v36, %v910_v46 }
 0x20b   :  { %v1024_v44 = vadd.f32 %v1023_v19, %v1022_v17  ;;  %v1029_v60 = vsel %vm400_vm1, %v1017_v56, 0.0  ;;  %v1019_v32 = vmul.f32 %v1003_v26, %v921_v24 }
 0x20c   :  { %v1031_v33 = vsel %vm400_vm1, %v1018_v51, 0.0 }
 0x20d   :  { %v1026_v21 = vadd.f32 %v1025_v45, %v1024_v44  ;;  %v1033_v0 = vsel %vm400_vm1, %v1019_v32, 0.0  ;;  %v1058_v45 = vld [vmem:[#allocation2 + $0x120] sm:$0xff]  ;;  %v1060_v32 = vld [vmem:[#allocation2 + $0x130] sm:$0xff] }
 0x20f   :  { %v1028_v25 = vadd.f32 %v1027_v23, %v1026_v21  ;;  %v1059_v23 = vld [vmem:[#allocation2 + $0x128] sm:$0xff] }
 0x211   :  { %v1030_v27 = vadd.f32 %v1029_v60, %v1028_v25 }
 0x213   :  { %v1032_v28 = vadd.f32 %v1031_v33, %v1030_v27 }
 0x215   :  { %v1034_v8 = vadd.f32 %v1033_v0, %v1032_v28  ;;  %v1061_v0 = vld [vmem:[#allocation2 + $0x138] sm:$0xff] }
 0x217   :  { %v1035_v12 = vmax.f32 %v1034_v8, 1.1754944e-38 }
 0x219   :  { %1739 = vlog2.f32 %v1035_v12  ;;  %v1041_v37 = vsel %vm400_vm1, %v1035_v12, -inf }
 0x21a   :  { %v1042_v38 = vrot.slane %v1041_v37, 4 }
 0x21c   :  { %v1043_v39 = vmax.f32 %v1041_v37, %v1042_v38 }
 0x21e   :  { %v1044_v41 = vrot.slane %v1043_v39, 2 }
 0x220   :  { %v1045_v29 = vmax.f32 %v1043_v39, %v1044_v41 }
 0x222   :  { %v1046_v47 = vrot.slane %v1045_v29, 1 }
 0x223   :  { %v1740_v30 = vpop.eup %1739 }
 0x224   :  { %v1037_v43 = vmul.f32 0.6931472, %v1740_v30  ;;  %v1047_v34 = vmax.f32 %v1045_v29, %v1046_v47 }
 0x226   :  { %v1038_v35 = vadd.f32 %v1037_v43, %v2179_v48  ;;  %1741 = vrcp.f32 %v1047_v34 }
 0x228   :  { %1628 = vst.msk [vmem:[%s2310_s4 + $0x18] sm:$0xff] %vm400_vm1, %v1038_v35 }
 0x230   :  { %v1742_v49 = vpop.eup %1741 }
 0x231   :  { %v1052_v52 = vmul.f32 %v1742_v49, %v1035_v12  ;;  %1743 = vlog2.f32 %v1742_v49 }
 0x233   :  { %v1070_v53 = vrot.slane %v1052_v52, %v2089_v9  ;;  %v1063_v54 = vcombine.high %v1052_v52, %v1052_v52 }
 0x235   :  { %v1078_v55 = vcombine.high %v1070_v53, %v1070_v53  ;;  %v1086_v57 = vrot.slane %v1070_v53, %v2089_v9  ;;  %v1077_v36 = vrot.slane %v1063_v54, %v2089_v9 }
 0x237   :  { %v1100_v50 = vrot.slane %v1078_v55, %v2089_v9  ;;  %v1115_v58 = vrot.slane %v1086_v57, %v2040_v31  ;;  %v1108_v59 = vcombine.high %v1086_v57, %v1086_v57  ;;  %v1079_v61 = vcombine.high %v1077_v36, %v1077_v36 }
 0x238   :  { %v1093_v63 = vrot.slane %v1077_v36, %v2089_v9 }
 0x239   :  { %v1119_v1 = vrot.slane %v1100_v50, %v2040_v31  ;;  %v1152_v2 = vmul.f32 %v1115_v58, %v1054_v62  ;;  %v1110_v3 = vcombine.high %v1100_v50, %v1100_v50  ;;  %v1123_v4 = vrot.slane %v1108_v59, %v2040_v31 }
 0x23a   :  { %v1107_v7 = vrot.slane %v1079_v61, %v2089_v9  ;;  %v1131_v10 = vrot.slane %v1093_v63, %v2040_v31  ;;  %v1109_v16 = vcombine.high %v1093_v63, %v1093_v63 }
 0x23b   :  { %v1153_v13 = vmul.f32 %v1119_v1, %v1055_v5  ;;  %v1127_v14 = vrot.slane %v1110_v3, %v2040_v31  ;;  %v1154_v15 = vmul.f32 %v1123_v4, %v1056_v6  ;;  %v1160_v17 = vsel %vm400_vm1, %v1152_v2, 0.0  ;;  %v1744_v43 = vpop.eup %1743  ;;  %v1194_v5 = vld [vmem:[#allocation2 + $0x140] sm:$0xff] }
 0x23c   :  { %v1135_v20 = vrot.slane %v1107_v7, %v2040_v31  ;;  %v1111_v44 = vcombine.high %v1107_v7, %v1107_v7  ;;  %v1156_v26 = vmul.f32 %v1131_v10, %v1058_v45  ;;  %v1139_v21 = vrot.slane %v1109_v16, %v2040_v31  ;;  %v1196_v16 = vld [vmem:[#allocation2 + $0x150] sm:$0xff]  ;;  %v1197_v45 = vld [vmem:[#allocation2 + $0x158] sm:$0xff] }
 0x23d   :  { %v1161_v19 = vsel %vm400_vm1, %v1153_v13, 0.0  ;;  %v1155_v42 = vmul.f32 %v1127_v14, %v1057_v18  ;;  %v1163_v56 = vsel %vm400_vm1, %v1154_v15, 0.0  ;;  %v1050_v35 = vmul.f32 0.6931472, %v1744_v43  ;;  %v1195_v15 = vld [vmem:[#allocation2 + $0x148] sm:$0xff] }
 0x23e   :  { %v1162_v11 = vadd.f32 %v1161_v19, %v1160_v17  ;;  %v1157_v25 = vmul.f32 %v1135_v20, %v1059_v23  ;;  %v1143_v24 = vrot.slane %v1111_v44, %v2040_v31  ;;  %v1167_v27 = vsel %vm400_vm1, %v1156_v26, 0.0 }
 0x23f   :  { %v1165_v51 = vsel %vm400_vm1, %v1155_v42, 0.0  ;;  %v1158_v33 = vmul.f32 %v1139_v21, %v1060_v32  ;;  %v2210_v55 = vsub.f32 %v2179_v48, %v1050_v35 }
 0x240   :  { %v1164_v22 = vadd.f32 %v1163_v56, %v1162_v11  ;;  %v1169_v8 = vsel %vm400_vm1, %v1157_v25, 0.0  ;;  %v1159_v12 = vmul.f32 %v1143_v24, %v1061_v0 }
 0x241   :  { %v1171_v38 = vsel %vm400_vm1, %v1158_v33, 0.0 }
 0x242   :  { %v1166_v60 = vadd.f32 %v1165_v51, %v1164_v22  ;;  %v1173_v40 = vsel %vm400_vm1, %v1159_v12, 0.0  ;;  %v1198_v51 = vld [vmem:[#allocation2 + $0x160] sm:$0xff]  ;;  %v1200_v12 = vld [vmem:[#allocation2 + $0x170] sm:$0xff] }
 0x244   :  { %v1168_v28 = vadd.f32 %v1167_v27, %v1166_v60  ;;  %v1199_v27 = vld [vmem:[#allocation2 + $0x168] sm:$0xff] }
 0x246   :  { %v1170_v37 = vadd.f32 %v1169_v8, %v1168_v28 }
 0x248   :  { %v1172_v39 = vadd.f32 %v1171_v38, %v1170_v37 }
 0x24a   :  { %v1174_v41 = vadd.f32 %v1173_v40, %v1172_v39  ;;  %v1201_v40 = vld [vmem:[#allocation2 + $0x178] sm:$0xff] }
 0x24c   :  { %v1175_v46 = vmax.f32 %v1174_v41, 1.1754944e-38 }
 0x24e   :  { %1745 = vlog2.f32 %v1175_v46  ;;  %v1181_v29 = vsel %vm400_vm1, %v1175_v46, -inf }
 0x24f   :  { %v1182_v47 = vrot.slane %v1181_v29, 4 }
 0x251   :  { %v1183_v30 = vmax.f32 %v1181_v29, %v1182_v47 }
 0x253   :  { %v1184_v34 = vrot.slane %v1183_v30, 2 }
 0x255   :  { %v1185_v52 = vmax.f32 %v1183_v30, %v1184_v34 }
 0x257   :  { %v1186_v53 = vrot.slane %v1185_v52, 1 }
 0x258   :  { %v1746_v54 = vpop.eup %1745 }
 0x259   :  { %v1177_v49 = vmul.f32 0.6931472, %v1746_v54  ;;  %v1187_v57 = vmax.f32 %v1185_v52, %v1186_v53 }
 0x25b   :  { %v1178_v36 = vadd.f32 %v1177_v49, %v2210_v55  ;;  %1747 = vrcp.f32 %v1187_v57 }
 0x25d   :  { %1629 = vst.msk [vmem:[%s2310_s4 + $0x20] sm:$0xff] %vm400_vm1, %v1178_v36 }
 0x265   :  { %v1748_v50 = vpop.eup %1747 }
 0x266   :  { %v1192_v58 = vmul.f32 %v1748_v50, %v1175_v46  ;;  %1749 = vlog2.f32 %v1748_v50 }
 0x268   :  { %v1210_v59 = vrot.slane %v1192_v58, %v2089_v9  ;;  %v1203_v61 = vcombine.high %v1192_v58, %v1192_v58 }
 0x26a   :  { %v1218_v62 = vcombine.high %v1210_v59, %v1210_v59  ;;  %v1226_v63 = vrot.slane %v1210_v59, %v2089_v9  ;;  %v1217_v48 = vrot.slane %v1203_v61, %v2089_v9 }
 0x26c   :  { %v1240_v1 = vrot.slane %v1218_v62, %v2089_v9  ;;  %v1255_v2 = vrot.slane %v1226_v63, %v2040_v31  ;;  %v1248_v3 = vcombine.high %v1226_v63, %v1226_v63  ;;  %v1219_v4 = vcombine.high %v1217_v48, %v1217_v48 }
 0x26d   :  { %v1233_v6 = vrot.slane %v1217_v48, %v2089_v9 }
 0x26e   :  { %v1259_v7 = vrot.slane %v1240_v1, %v2040_v31  ;;  %v1292_v10 = vmul.f32 %v1255_v2, %v1194_v5  ;;  %v1250_v13 = vcombine.high %v1240_v1, %v1240_v1  ;;  %v1263_v14 = vrot.slane %v1248_v3, %v2040_v31 }
 0x26f   :  { %v1247_v17 = vrot.slane %v1219_v4, %v2089_v9  ;;  %v1271_v18 = vrot.slane %v1233_v6, %v2040_v31  ;;  %v1249_v44 = vcombine.high %v1233_v6, %v1233_v6 }
 0x270   :  { %v1293_v19 = vmul.f32 %v1259_v7, %v1195_v15  ;;  %v1267_v42 = vrot.slane %v1250_v13, %v2040_v31  ;;  %v1294_v20 = vmul.f32 %v1263_v14, %v1196_v16  ;;  %v1300_v11 = vsel %vm400_vm1, %v1292_v10, 0.0  ;;  %v1750_v49 = vpop.eup %1749  ;;  %v1334_v15 = vld [vmem:[#allocation2 + $0x180] sm:$0xff] }
 0x271   :  { %v1275_v21 = vrot.slane %v1247_v17, %v2040_v31  ;;  %v1251_v22 = vcombine.high %v1247_v17, %v1247_v17  ;;  %v1296_v24 = vmul.f32 %v1271_v18, %v1198_v51  ;;  %v1279_v60 = vrot.slane %v1249_v44, %v2040_v31  ;;  %v1336_v44 = vld [vmem:[#allocation2 + $0x190] sm:$0xff]  ;;  %v1337_v51 = vld [vmem:[#allocation2 + $0x198] sm:$0xff] }
 0x272   :  { %v1301_v56 = vsel %vm400_vm1, %v1293_v19, 0.0  ;;  %v1295_v26 = vmul.f32 %v1267_v42, %v1197_v45  ;;  %v1303_v25 = vsel %vm400_vm1, %v1294_v20, 0.0  ;;  %v1190_v36 = vmul.f32 0.6931472, %v1750_v49  ;;  %v1335_v20 = vld [vmem:[#allocation2 + $0x188] sm:$0xff] }
 0x273   :  { %v1302_v23 = vadd.f32 %v1301_v56, %v1300_v11  ;;  %v1297_v28 = vmul.f32 %v1275_v21, %v1199_v27  ;;  %v1283_v0 = vrot.slane %v1251_v22, %v2040_v31  ;;  %v1307_v37 = vsel %vm400_vm1, %v1296_v24, 0.0 }
 0x274   :  { %v1305_v33 = vsel %vm400_vm1, %v1295_v26, 0.0  ;;  %v1298_v38 = vmul.f32 %v1279_v60, %v1200_v12  ;;  %v2241_v62 = vsub.f32 %v2210_v55, %v1190_v36 }
 0x275   :  { %v1304_v32 = vadd.f32 %v1303_v25, %v1302_v23  ;;  %v1309_v41 = vsel %vm400_vm1, %v1297_v28, 0.0  ;;  %v1299_v46 = vmul.f32 %v1283_v0, %v1201_v40 }
 0x276   :  { %v1311_v47 = vsel %vm400_vm1, %v1298_v38, 0.0 }
 0x277   :  { %v1306_v8 = vadd.f32 %v1305_v33, %v1304_v32  ;;  %v1313_v43 = vsel %vm400_vm1, %v1299_v46, 0.0  ;;  %v1338_v33 = vld [vmem:[#allocation2 + $0x1a0] sm:$0xff]  ;;  %v1340_v46 = vld [vmem:[#allocation2 + $0x1b0] sm:$0xff] }
 0x279   :  { %v1308_v39 = vadd.f32 %v1307_v37, %v1306_v8  ;;  %v1339_v37 = vld [vmem:[#allocation2 + $0x1a8] sm:$0xff] }
 0x27b   :  { %v1310_v29 = vadd.f32 %v1309_v41, %v1308_v39 }
 0x27d   :  { %v1312_v30 = vadd.f32 %v1311_v47, %v1310_v29 }
 0x27f   :  { %v1314_v34 = vadd.f32 %v1313_v43, %v1312_v30  ;;  %v1341_v43 = vld [vmem:[#allocation2 + $0x1b8] sm:$0xff] }
 0x281   :  { %v1315_v35 = vmax.f32 %v1314_v34, 1.1754944e-38 }
 0x283   :  { %1751 = vlog2.f32 %v1315_v35  ;;  %v1321_v52 = vsel %vm400_vm1, %v1315_v35, -inf }
 0x284   :  { %v1322_v53 = vrot.slane %v1321_v52, 4 }
 0x286   :  { %v1323_v54 = vmax.f32 %v1321_v52, %v1322_v53 }
 0x288   :  { %v1324_v57 = vrot.slane %v1323_v54, 2 }
 0x28a   :  { %v1325_v58 = vmax.f32 %v1323_v54, %v1324_v57 }
 0x28c   :  { %v1326_v59 = vrot.slane %v1325_v58, 1 }
 0x28d   :  { %v1752_v61 = vpop.eup %1751 }
 0x28e   :  { %v1317_v50 = vmul.f32 0.6931472, %v1752_v61  ;;  %v1327_v63 = vmax.f32 %v1325_v58, %v1326_v59 }
 0x290   :  { %v1318_v48 = vadd.f32 %v1317_v50, %v2241_v62  ;;  %1753 = vrcp.f32 %v1327_v63 }
 0x292   :  { %1630 = vst.msk [vmem:[%s2310_s4 + $0x28] sm:$0xff] %vm400_vm1, %v1318_v48 }
 0x29a   :  { %v1754_v1 = vpop.eup %1753 }
 0x29b   :  { %v1332_v2 = vmul.f32 %v1754_v1, %v1315_v35  ;;  %1755 = vlog2.f32 %v1754_v1 }
 0x29d   :  { %v1350_v3 = vrot.slane %v1332_v2, %v2089_v9  ;;  %v1343_v4 = vcombine.high %v1332_v2, %v1332_v2 }
 0x29f   :  { %v1358_v5 = vcombine.high %v1350_v3, %v1350_v3  ;;  %v1366_v6 = vrot.slane %v1350_v3, %v2089_v9  ;;  %v1357_v55 = vrot.slane %v1343_v4, %v2089_v9 }
 0x2a1   :  { %v1380_v7 = vrot.slane %v1358_v5, %v2089_v9  ;;  %v1395_v10 = vrot.slane %v1366_v6, %v2040_v31  ;;  %v1388_v13 = vcombine.high %v1366_v6, %v1366_v6  ;;  %v1359_v14 = vcombine.high %v1357_v55, %v1357_v55 }
 0x2a2   :  { %v1373_v16 = vrot.slane %v1357_v55, %v2089_v9 }
 0x2a3   :  { %v1399_v17 = vrot.slane %v1380_v7, %v2040_v31  ;;  %v1432_v18 = vmul.f32 %v1395_v10, %v1334_v15  ;;  %v1390_v19 = vcombine.high %v1380_v7, %v1380_v7  ;;  %v1403_v42 = vrot.slane %v1388_v13, %v2040_v31 }
 0x2a4   :  { %v1387_v11 = vrot.slane %v1359_v14, %v2089_v9  ;;  %v1411_v45 = vrot.slane %v1373_v16, %v2040_v31  ;;  %v1389_v22 = vcombine.high %v1373_v16, %v1373_v16 }
 0x2a5   :  { %v1433_v56 = vmul.f32 %v1399_v17, %v1335_v20  ;;  %v1407_v26 = vrot.slane %v1390_v19, %v2040_v31  ;;  %v1434_v21 = vmul.f32 %v1403_v42, %v1336_v44  ;;  %v1440_v23 = vsel %vm400_vm1, %v1432_v18, 0.0  ;;  %v1756_v50 = vpop.eup %1755  ;;  %v1474_v20 = vld [vmem:[#allocation2 + $0x1c0] sm:$0xff] }
 0x2a6   :  { %v1415_v60 = vrot.slane %v1387_v11, %v2040_v31  ;;  %v1391_v32 = vcombine.high %v1387_v11, %v1387_v11  ;;  %v1436_v0 = vmul.f32 %v1411_v45, %v1338_v33  ;;  %v1419_v8 = vrot.slane %v1389_v22, %v2040_v31  ;;  %v1476_v22 = vld [vmem:[#allocation2 + $0x1d0] sm:$0xff]  ;;  %v1477_v33 = vld [vmem:[#allocation2 + $0x1d8] sm:$0xff] }
 0x2a7   :  { %v1441_v25 = vsel %vm400_vm1, %v1433_v56, 0.0  ;;  %v1435_v24 = vmul.f32 %v1407_v26, %v1337_v51  ;;  %v1443_v28 = vsel %vm400_vm1, %v1434_v21, 0.0  ;;  %v1330_v48 = vmul.f32 0.6931472, %v1756_v50  ;;  %v1475_v21 = vld [vmem:[#allocation2 + $0x1c8] sm:$0xff] }
 0x2a8   :  { %v1442_v27 = vadd.f32 %v1441_v25, %v1440_v23  ;;  %v1437_v39 = vmul.f32 %v1415_v60, %v1339_v37  ;;  %v1423_v40 = vrot.slane %v1391_v32, %v2040_v31  ;;  %v1447_v29 = vsel %vm400_vm1, %v1436_v0, 0.0 }
 0x2a9   :  { %v1445_v38 = vsel %vm400_vm1, %v1435_v24, 0.0  ;;  %v1438_v47 = vmul.f32 %v1419_v8, %v1340_v46  ;;  %v2272_v5 = vsub.f32 %v2241_v62, %v1330_v48  ;;  %v1479_v46 = vld [vmem:[#allocation2 + $0x1e8] sm:$0xff] }
 0x2aa   :  { %v1444_v12 = vadd.f32 %v1443_v28, %v1442_v27  ;;  %v1449_v34 = vsel %vm400_vm1, %v1437_v39, 0.0  ;;  %v1439_v35 = vmul.f32 %v1423_v40, %v1341_v43 }
 0x2ab   :  { %v1451_v53 = vsel %vm400_vm1, %v1438_v47, 0.0 }
 0x2ac   :  { %v1446_v41 = vadd.f32 %v1445_v38, %v1444_v12  ;;  %v1453_v49 = vsel %vm400_vm1, %v1439_v35, 0.0  ;;  %v1478_v38 = vld [vmem:[#allocation2 + $0x1e0] sm:$0xff] }
 0x2ae   :  { %v1448_v30 = vadd.f32 %v1447_v29, %v1446_v41 }
 0x2b0   :  { %v1450_v52 = vadd.f32 %v1449_v34, %v1448_v30  ;;  %v1480_v34 = vld [vmem:[#allocation2 + $0x1f0] sm:$0xff] }
 0x2b2   :  { %v1452_v54 = vadd.f32 %v1451_v53, %v1450_v52 }
 0x2b4   :  { %v1454_v57 = vadd.f32 %v1453_v49, %v1452_v54  ;;  %v1481_v54 = vld [vmem:[#allocation2 + $0x1f8] sm:$0xff] }
 0x2b6   :  { %v1455_v36 = vmax.f32 %v1454_v57, 1.1754944e-38 }
 0x2b8   :  { %1757 = vlog2.f32 %v1455_v36  ;;  %v1461_v58 = vsel %vm400_vm1, %v1455_v36, -inf }
 0x2b9   :  { %v1462_v59 = vrot.slane %v1461_v58, 4 }
 0x2bb   :  { %v1463_v61 = vmax.f32 %v1461_v58, %v1462_v59 }
 0x2bd   :  { %v1464_v63 = vrot.slane %v1463_v61, 2 }
 0x2bf   :  { %v1465_v2 = vmax.f32 %v1463_v61, %v1464_v63 }
 0x2c1   :  { %v1466_v3 = vrot.slane %v1465_v2, 1 }
 0x2c2   :  { %v1758_v4 = vpop.eup %1757 }
 0x2c3   :  { %v1457_v1 = vmul.f32 0.6931472, %v1758_v4  ;;  %v1467_v6 = vmax.f32 %v1465_v2, %v1466_v3 }
 0x2c5   :  { %v1458_v55 = vadd.f32 %v1457_v1, %v2272_v5  ;;  %1759 = vrcp.f32 %v1467_v6 }
 0x2c7   :  { %1631 = vst.msk [vmem:[%s2310_s4 + $0x30] sm:$0xff] %vm400_vm1, %v1458_v55 }
 0x2cf   :  { %v1760_v7 = vpop.eup %1759 }
 0x2d0   :  { %v1472_v10 = vmul.f32 %v1760_v7, %v1455_v36  ;;  %1761 = vlog2.f32 %v1760_v7 }
 0x2d2   :  { %v1490_v13 = vrot.slane %v1472_v10, %v2089_v9  ;;  %v1483_v14 = vcombine.high %v1472_v10, %v1472_v10 }
 0x2d4   :  { %v1498_v15 = vcombine.high %v1490_v13, %v1490_v13  ;;  %v1506_v16 = vrot.slane %v1490_v13, %v2089_v9  ;;  %v1497_v62 = vrot.slane %v1483_v14, %v2089_v9 }
 0x2d6   :  { %v1520_v17 = vrot.slane %v1498_v15, %v2089_v9  ;;  %v1535_v18 = vrot.slane %v1506_v16, %v2040_v31  ;;  %v1528_v19 = vcombine.high %v1506_v16, %v1506_v16  ;;  %v1499_v42 = vcombine.high %v1497_v62, %v1497_v62 }
 0x2d7   :  { %v1513_v44 = vrot.slane %v1497_v62, %v2089_v9 }
 0x2d8   :  { %v1539_v11 = vrot.slane %v1520_v17, %v2040_v31  ;;  %v1572_v45 = vmul.f32 %v1535_v18, %v1474_v20  ;;  %v1530_v56 = vcombine.high %v1520_v17, %v1520_v17  ;;  %v1543_v26 = vrot.slane %v1528_v19, %v2040_v31 }
 0x2d9   :  { %v1527_v23 = vrot.slane %v1499_v42, %v2089_v9  ;;  %v1551_v51 = vrot.slane %v1513_v44, %v2040_v31  ;;  %v1529_v32 = vcombine.high %v1513_v44, %v1513_v44 }
 0x2da   :  { %v1573_v25 = vmul.f32 %v1539_v11, %v1475_v21  ;;  %v1547_v24 = vrot.slane %v1530_v56, %v2040_v31  ;;  %v1574_v60 = vmul.f32 %v1543_v26, %v1476_v22  ;;  %v1580_v27 = vsel %vm400_vm1, %v1572_v45, 0.0 }
 0x2db   :  { %v1555_v8 = vrot.slane %v1527_v23, %v2040_v31  ;;  %v1531_v12 = vcombine.high %v1527_v23, %v1527_v23  ;;  %v1576_v39 = vmul.f32 %v1551_v51, %v1478_v38  ;;  %v1559_v40 = vrot.slane %v1529_v32, %v2040_v31 }
 0x2dc   :  { %v1581_v28 = vsel %vm400_vm1, %v1573_v25, 0.0  ;;  %v1575_v0 = vmul.f32 %v1547_v24, %v1477_v33  ;;  %v1583_v9 = vsel %vm400_vm1, %v1574_v60, 0.0 }
 0x2dd   :  { %v1582_v37 = vadd.f32 %v1581_v28, %v1580_v27  ;;  %v1577_v47 = vmul.f32 %v1555_v8, %v1479_v46  ;;  %v1563_v30 = vrot.slane %v1531_v12, %v2040_v31  ;;  %v1587_v35 = vsel %vm400_vm1, %v1576_v39, 0.0  ;;  %v1762_v31 = vpop.eup %1761 }
 0x2de   :  { %v1585_v29 = vsel %vm400_vm1, %v1575_v0, 0.0  ;;  %v1578_v52 = vmul.f32 %v1559_v40, %v1480_v34  ;;  %v1470_v48 = vmul.f32 0.6931472, %v1762_v31 }
 0x2df   :  { %v1584_v41 = vadd.f32 %v1583_v9, %v1582_v37  ;;  %v1589_v49 = vsel %vm400_vm1, %v1577_v47, 0.0  ;;  %v1579_v57 = vmul.f32 %v1563_v30, %v1481_v54 }
 0x2e0   :  { %v1591_v58 = vsel %vm400_vm1, %v1578_v52, 0.0  ;;  %v1471_v3 = vsub.f32 %v2272_v5, %v1470_v48 }
 0x2e1   :  { %v1586_v43 = vadd.f32 %v1585_v29, %v1584_v41  ;;  %v1593_v61 = vsel %vm400_vm1, %v1579_v57, 0.0 }
 0x2e3   :  { %v1588_v53 = vadd.f32 %v1587_v35, %v1586_v43 }
 0x2e5   :  { %v1590_v36 = vadd.f32 %v1589_v49, %v1588_v53 }
 0x2e7   :  { %v1592_v59 = vadd.f32 %v1591_v58, %v1590_v36 }
 0x2e9   :  { %v1594_v50 = vadd.f32 %v1593_v61, %v1592_v59 }
 0x2eb   :  { %v1595_v63 = vmax.f32 %v1594_v50, 1.1754944e-38 }
 0x2ed   :  { %1763 = vlog2.f32 %v1595_v63 }
 0x2f7   :  { %v1764_v2 = vpop.eup %1763 }
 0x2f8   :  { %v1597_v4 = vmul.f32 0.6931472, %v1764_v2 }
 0x2fa   :  { %v1598_v1 = vadd.f32 %v1597_v4, %v1471_v3 }
 0x2fc   :  { %1632 = vst.msk [vmem:[%s2310_s4 + $0x38] sm:$0xff] %vm400_vm1, %v1598_v1 }

</bundles_post_ra>
